<compile_context>
chip_gen: v7x
topology: tpu7x:2x2x1
jax: 0.10.0
libtpu: 0.0.40
codegen_flags: <defaults>
</compile_context>

<pallas_src>
import functools

import jax
import jax.numpy as jnp
from jax import lax
from jax.experimental import pallas as pl
from jax.experimental.pallas import tpu as pltpu

_EPS = 1e-8  # torch F.cosine_similarity default eps


def _cosformer_kernel(q_ref, k_ref, v_ref, out_ref, attn_ref, *, temperature):
    # q_ref: (TQ, G, D)    k_ref / v_ref: (L, G, D)
    # out_ref: (G, TQ, D)  attn_ref:      (G, TQ, L)
    num_heads = q_ref.shape[1]
    t2 = jnp.float32(temperature * temperature)
    clamp = jnp.float32((_EPS * temperature) ** 2)

    for g in range(num_heads):          # static unroll over the head group
        qg = q_ref[:, g, :]             # (TQ, D), native dtype -> MXU
        kg = k_ref[:, g, :]             # (L, D)
        vg = v_ref[:, g, :]             # (L, D)

        # q @ k^T, contracting the last dims of both operands directly
        # (no transpose of the (L, D) key tile).
        s = lax.dot_general(
            qg, kg,
            dimension_numbers=(((1,), (1,)), ((), ())),
            preferred_element_type=jnp.float32)                 # (TQ, L)

        # Cosine-similarity denominator (product-of-norms clamp, fp32) with the
        # temperature folded into the rsqrt argument:
        #   s * rsqrt(max(t^2 * |q|^2 * |k|^2, (eps*t)^2))
        #     == (s / sqrt(max(|q|^2 * |k|^2, eps^2))) / t
        qf = qg.astype(jnp.float32)
        kf = kg.astype(jnp.float32)
        w1 = jnp.sum(qf * qf, axis=-1, keepdims=True) * t2      # (TQ, 1)
        w2 = jnp.sum(kf * kf, axis=-1, keepdims=True)           # (L, 1)
        inv_denom = lax.rsqrt(jnp.maximum(w1 * w2.T, clamp))    # (TQ, L)
        logits = s * inv_denom

        # numerically stable softmax over keys
        m = jnp.max(logits, axis=-1, keepdims=True)
        p = jnp.exp(logits - m)
        l = jnp.sum(p, axis=-1, keepdims=True)
        attn = p * pl.reciprocal(l, approx=True)                # (TQ, L), fp32

        # probabilities cast back to the value dtype before the MXU matmul
        out = jnp.dot(attn.astype(vg.dtype), vg,
                      preferred_element_type=jnp.float32)       # (TQ, D)

        out_ref[g] = out.astype(out_ref.dtype)
        attn_ref[g] = attn.astype(attn_ref.dtype)


def _choose_head_block(num_heads, head_dim):
    """Heads per grid step: the full H, or a multiple-of-8 divisor of H (Mosaic's
    sublane rule for the second-to-last block dim of the q/k/v blocks).  Prefer at
    least ceil(128 / D) heads so each step has enough rows / lanes of work."""
    target = -(-128 // max(head_dim, 1))
    for g in range(8, num_heads, 8):
        if num_heads % g == 0 and g >= target:
            return g
    return num_heads


def _choose_q_block(seq_len, heads_per_step, head_dim, itemsize,
                    vmem_budget_bytes=24 * 1024 * 1024):
    """Largest query tile (== L, or a multiple-of-8 divisor of L) whose
    double-buffered Pallas blocks plus fp32 temporaries fit the VMEM budget."""
    candidates = [seq_len] + [
        c for c in (4096, 2048, 1024, 512, 256, 128, 64, 32, 16, 8)
        if c < seq_len and seq_len % c == 0]
    for tq in candidates:                     # descending: first fit is the largest
        blocks = 2 * itemsize * heads_per_step * (
            2 * seq_len * head_dim            # resident k and v tiles
            + tq * head_dim                   # q tile
            + tq * head_dim                   # out tile
            + tq * seq_len)                   # attn tile
        temps = 4 * 4 * tq * seq_len          # fp32 logits/probs temporaries (1 head)
        if blocks + temps <= vmem_budget_bytes:
            return tq
    return candidates[-1]


def cosformer_attention(q, k, v, temperature, *,
                        q_block=None, head_block=None, attn_dtype=None):
    """q, k, v: (B, L, H, D).  Returns (output (B, H, L, D), attn (B, H, L, L))."""
    B, L, H, D = q.shape
    G = head_block if head_block is not None else _choose_head_block(H, D)
    if H % G != 0 or not (G == H or G % 8 == 0):
        raise ValueError(f"head_block={G} must divide H={H} and be H or a multiple of 8")
    TQ = q_block if q_block is not None else _choose_q_block(L, G, D, q.dtype.itemsize)
    if L % TQ != 0 or not (TQ == L or TQ % 8 == 0):
        raise ValueError(f"q_block={TQ} must divide L={L} and be L or a multiple of 8")
    attn_dtype = jnp.dtype(attn_dtype) if attn_dtype is not None else q.dtype

    kernel = functools.partial(_cosformer_kernel, temperature=float(temperature))

    out, attn = pl.pallas_call(
        kernel,
        out_shape=(
            jax.ShapeDtypeStruct((B, H, L, D), q.dtype),
            jax.ShapeDtypeStruct((B, H, L, L), attn_dtype),
        ),
        grid_spec=pltpu.PrefetchScalarGridSpec(
            num_scalar_prefetch=0,
            grid=(B, H // G, L // TQ),
            in_specs=[
                # strided DMAs straight from the (B, L, H, D) layout; no wrapper transposes
                pl.BlockSpec((None, TQ, G, D), lambda b, h, i: (b, i, h, 0)),
                pl.BlockSpec((None, L, G, D), lambda b, h, i: (b, 0, h, 0)),
                pl.BlockSpec((None, L, G, D), lambda b, h, i: (b, 0, h, 0)),
            ],
            out_specs=[
                pl.BlockSpec((None, G, TQ, D), lambda b, h, i: (b, h, i, 0)),
                pl.BlockSpec((None, G, TQ, L), lambda b, h, i: (b, h, i, 0)),
            ],
        ),
        compiler_params=pltpu.CompilerParams(
            dimension_semantics=("parallel", "parallel", "parallel"),
            vmem_limit_bytes=48 * 1024 * 1024,
        ),
    )(q, k, v)
    return out, attn


def _reference(q, k, v, temperature):
    # Pure-JAX reference mirroring the PyTorch forward (eval mode, no mask).
    qt = jnp.transpose(q, (0, 2, 1, 3)).astype(jnp.float32)
    kt = jnp.transpose(k, (0, 2, 1, 3)).astype(jnp.float32)
    vt = jnp.transpose(v, (0, 2, 1, 3)).astype(jnp.float32)
    s = jnp.einsum("bhid,bhjd->bhij", qt, kt)
    w1 = jnp.sum(qt * qt, axis=-1)
    w2 = jnp.sum(kt * kt, axis=-1)
    denom = jnp.sqrt(jnp.maximum(w1[..., :, None] * w2[..., None, :], _EPS * _EPS))
    attn = (s / denom) / temperature
    attn = jax.nn.softmax(attn, axis=-1)
    out = jnp.einsum("bhij,bhjd->bhid", attn, vt)
    return out, attn


if __name__ == "__main__":
    B, L, H, D = 2, 8, 4, 32
    temperature = float(D) ** 0.5

    key = jax.random.PRNGKey(0)
    kq, kk, kv = jax.random.split(key, 3)
    q = jax.random.normal(kq, (B, L, H, D), dtype=jnp.float32)
    k = jax.random.normal(kk, (B, L, H, D), dtype=jnp.float32)
    v = jax.random.normal(kv, (B, L, H, D), dtype=jnp.float32)

    out, attn = cosformer_attention(q, k, v, temperature)
    jax.block_until_ready((out, attn))

    out_ref, attn_ref = _reference(q, k, v, temperature)
    # tolerance accounts for pl.reciprocal(approx=True) in the softmax denominator
    assert jnp.allclose(out, out_ref, atol=1e-3, rtol=1e-3), \
        float(jnp.max(jnp.abs(out - out_ref)))
    assert jnp.allclose(attn, attn_ref, atol=1e-3, rtol=1e-3), \
        float(jnp.max(jnp.abs(attn - attn_ref)))

    print("KERNEL_OK")
</pallas_src>

<mosaic_0001>
module attributes {stable_mosaic.version = 11 : i64} {
  func.func @_cosformer_kernel(%arg0: i32, %arg1: i32, %arg2: i32, %arg3: memref<1x8x4x32xf32, #tpu.memory_space<vmem>>, %arg4: memref<1x8x4x32xf32, #tpu.memory_space<vmem>>, %arg5: memref<1x8x4x32xf32, #tpu.memory_space<vmem>>, %arg6: memref<1x4x8x32xf32, #tpu.memory_space<vmem>>, %arg7: memref<1x4x8x8xf32, #tpu.memory_space<vmem>>) attributes {dimension_semantics = [#tpu.dimension_semantics<parallel>, #tpu.dimension_semantics<parallel>, #tpu.dimension_semantics<parallel>], iteration_bounds = array<i64: 2, 1, 1>, scalar_prefetch = 0 : i64, scratch_operands = 0 : i64, tpu.core_type = #tpu.core_type<tc>, window_params = [{transform_indices = @transform_0, window_bounds = array<i64: 1, 8, 4, 32>}, {transform_indices = @transform_1, window_bounds = array<i64: 1, 8, 4, 32>}, {transform_indices = @transform_2, window_bounds = array<i64: 1, 8, 4, 32>}, {transform_indices = @transform_3, window_bounds = array<i64: 1, 4, 8, 32>}, {transform_indices = @transform_4, window_bounds = array<i64: 1, 4, 8, 8>}]} {
    %c0 = arith.constant 0 : index
    %c0_0 = arith.constant 0 : index
    %c0_1 = arith.constant 0 : index
    %c0_2 = arith.constant 0 : index
    %0 = vector.load %arg3[%c0, %c0_0, %c0_1, %c0_2] : memref<1x8x4x32xf32, #tpu.memory_space<vmem>>, vector<1x8x1x32xf32>
    %1 = vector.shape_cast %0 : vector<1x8x1x32xf32> to vector<8x32xf32>
    %c0_3 = arith.constant 0 : index
    %c0_4 = arith.constant 0 : index
    %c0_5 = arith.constant 0 : index
    %c0_6 = arith.constant 0 : index
    %2 = vector.load %arg4[%c0_3, %c0_4, %c0_5, %c0_6] : memref<1x8x4x32xf32, #tpu.memory_space<vmem>>, vector<1x8x1x32xf32>
    %3 = vector.shape_cast %2 : vector<1x8x1x32xf32> to vector<8x32xf32>
    %c0_7 = arith.constant 0 : index
    %c0_8 = arith.constant 0 : index
    %c0_9 = arith.constant 0 : index
    %c0_10 = arith.constant 0 : index
    %4 = vector.load %arg5[%c0_7, %c0_8, %c0_9, %c0_10] : memref<1x8x4x32xf32, #tpu.memory_space<vmem>>, vector<1x8x1x32xf32>
    %5 = vector.shape_cast %4 : vector<1x8x1x32xf32> to vector<8x32xf32>
    %cst = arith.constant dense<0.000000e+00> : vector<8x8xf32>
    %6 = tpu.matmul %1, %3, %cst {dimension_numbers = #tpu.dot_dimension_numbers<[1], [1], [0], [0], [0, 0, 1, 0], [], []>} : vector<8x32xf32>, vector<8x32xf32>, vector<8x8xf32> -> vector<8x8xf32>
    %7 = arith.mulf %1, %1 : vector<8x32xf32>
    %cst_11 = arith.constant dense<0.000000e+00> : vector<8xf32>
    %8 = vector.multi_reduction <add>, %7, %cst_11 [1] : vector<8x32xf32> to vector<8xf32>
    %9 = vector.shape_cast %8 : vector<8xf32> to vector<8x1xf32>
    %cst_12 = arith.constant 3.200000e+01 : f32
    %10 = vector.broadcast %cst_12 : f32 to vector<8x1xf32>
    %11 = arith.mulf %9, %10 : vector<8x1xf32>
    %12 = arith.mulf %3, %3 : vector<8x32xf32>
    %cst_13 = arith.constant dense<0.000000e+00> : vector<8xf32>
    %13 = vector.multi_reduction <add>, %12, %cst_13 [1] : vector<8x32xf32> to vector<8xf32>
    %14 = vector.shape_cast %13 : vector<8xf32> to vector<8x1xf32>
    %15 = tpu.transpose %14, [1, 0] : vector<8x1xf32> -> vector<1x8xf32>
    %16 = vector.broadcast %11 : vector<8x1xf32> to vector<8x8xf32>
    %17 = vector.broadcast %15 : vector<1x8xf32> to vector<8x8xf32>
    %18 = arith.mulf %16, %17 : vector<8x8xf32>
    %cst_14 = arith.constant 3.200000e-15 : f32
    %19 = vector.broadcast %cst_14 : f32 to vector<8x8xf32>
    %20 = arith.maximumf %18, %19 : vector<8x8xf32>
    %21 = math.rsqrt %20 : vector<8x8xf32>
    %22 = arith.mulf %6, %21 : vector<8x8xf32>
    %cst_15 = arith.constant dense<0xFF800000> : vector<8xf32>
    %23 = vector.multi_reduction <maximumf>, %22, %cst_15 [1] : vector<8x8xf32> to vector<8xf32>
    %24 = vector.shape_cast %23 : vector<8xf32> to vector<8x1xf32>
    %25 = vector.broadcast %24 : vector<8x1xf32> to vector<8x8xf32>
    %26 = arith.subf %22, %25 : vector<8x8xf32>
    %27 = math.exp %26 : vector<8x8xf32>
    %cst_16 = arith.constant dense<0.000000e+00> : vector<8xf32>
    %28 = vector.multi_reduction <add>, %27, %cst_16 [1] : vector<8x8xf32> to vector<8xf32>
    %29 = vector.shape_cast %28 : vector<8xf32> to vector<8x1xf32>
    %30 = tpu.reciprocal %29 {approx = true} : vector<8x1xf32> -> vector<8x1xf32>
    %31 = vector.broadcast %30 : vector<8x1xf32> to vector<8x8xf32>
    %32 = arith.mulf %27, %31 : vector<8x8xf32>
    %cst_17 = arith.constant dense<0.000000e+00> : vector<8x32xf32>
    %33 = tpu.matmul %32, %5, %cst_17 {dimension_numbers = #tpu.dot_dimension_numbers<[1], [0], [0], [1], [0, 0, 1, 1], [], []>} : vector<8x8xf32>, vector<8x32xf32>, vector<8x32xf32> -> vector<8x32xf32>
    %c0_18 = arith.constant 0 : index
    %c0_19 = arith.constant 0 : index
    %c0_20 = arith.constant 0 : index
    %c0_21 = arith.constant 0 : index
    %34 = vector.load %arg6[%c0_18, %c0_19, %c0_20, %c0_21] : memref<1x4x8x32xf32, #tpu.memory_space<vmem>>, vector<1x1x8x32xf32>
    %35 = vector.shape_cast %34 : vector<1x1x8x32xf32> to vector<8x32xf32>
    %36 = vector.shape_cast %33 : vector<8x32xf32> to vector<1x1x8x32xf32>
    tpu.vector_store %arg6[%c0_18, %c0_19, %c0_20, %c0_21], %36 {strides = array<i32>} : memref<1x4x8x32xf32, #tpu.memory_space<vmem>>, vector<1x1x8x32xf32>,
    %c0_22 = arith.constant 0 : index
    %c0_23 = arith.constant 0 : index
    %c0_24 = arith.constant 0 : index
    %c0_25 = arith.constant 0 : index
    %37 = vector.load %arg7[%c0_22, %c0_23, %c0_24, %c0_25] : memref<1x4x8x8xf32, #tpu.memory_space<vmem>>, vector<1x1x8x8xf32>
    %38 = vector.shape_cast %37 : vector<1x1x8x8xf32> to vector<8x8xf32>
    %39 = vector.shape_cast %32 : vector<8x8xf32> to vector<1x1x8x8xf32>
    tpu.vector_store %arg7[%c0_22, %c0_23, %c0_24, %c0_25], %39 {strides = array<i32>} : memref<1x4x8x8xf32, #tpu.memory_space<vmem>>, vector<1x1x8x8xf32>,
    %c0_26 = arith.constant 0 : index
    %c0_27 = arith.constant 0 : index
    %c1 = arith.constant 1 : index
    %c0_28 = arith.constant 0 : index
    %40 = vector.load %arg3[%c0_26, %c0_27, %c1, %c0_28] : memref<1x8x4x32xf32, #tpu.memory_space<vmem>>, vector<1x8x1x32xf32>
    %41 = vector.shape_cast %40 : vector<1x8x1x32xf32> to vector<8x32xf32>
    %c0_29 = arith.constant 0 : index
    %c0_30 = arith.constant 0 : index
    %c1_31 = arith.constant 1 : index
    %c0_32 = arith.constant 0 : index
    %42 = vector.load %arg4[%c0_29, %c0_30, %c1_31, %c0_32] : memref<1x8x4x32xf32, #tpu.memory_space<vmem>>, vector<1x8x1x32xf32>
    %43 = vector.shape_cast %42 : vector<1x8x1x32xf32> to vector<8x32xf32>
    %c0_33 = arith.constant 0 : index
    %c0_34 = arith.constant 0 : index
    %c1_35 = arith.constant 1 : index
    %c0_36 = arith.constant 0 : index
    %44 = vector.load %arg5[%c0_33, %c0_34, %c1_35, %c0_36] : memref<1x8x4x32xf32, #tpu.memory_space<vmem>>, vector<1x8x1x32xf32>
    %45 = vector.shape_cast %44 : vector<1x8x1x32xf32> to vector<8x32xf32>
    %cst_37 = arith.constant dense<0.000000e+00> : vector<8x8xf32>
    %46 = tpu.matmul %41, %43, %cst_37 {dimension_numbers = #tpu.dot_dimension_numbers<[1], [1], [0], [0], [0, 0, 1, 0], [], []>} : vector<8x32xf32>, vector<8x32xf32>, vector<8x8xf32> -> vector<8x8xf32>
    %47 = arith.mulf %41, %41 : vector<8x32xf32>
    %cst_38 = arith.constant dense<0.000000e+00> : vector<8xf32>
    %48 = vector.multi_reduction <add>, %47, %cst_38 [1] : vector<8x32xf32> to vector<8xf32>
    %49 = vector.shape_cast %48 : vector<8xf32> to vector<8x1xf32>
    %cst_39 = arith.constant 3.200000e+01 : f32
    %50 = vector.broadcast %cst_39 : f32 to vector<8x1xf32>
    %51 = arith.mulf %49, %50 : vector<8x1xf32>
    %52 = arith.mulf %43, %43 : vector<8x32xf32>
    %cst_40 = arith.constant dense<0.000000e+00> : vector<8xf32>
    %53 = vector.multi_reduction <add>, %52, %cst_40 [1] : vector<8x32xf32> to vector<8xf32>
    %54 = vector.shape_cast %53 : vector<8xf32> to vector<8x1xf32>
    %55 = tpu.transpose %54, [1, 0] : vector<8x1xf32> -> vector<1x8xf32>
    %56 = vector.broadcast %51 : vector<8x1xf32> to vector<8x8xf32>
    %57 = vector.broadcast %55 : vector<1x8xf32> to vector<8x8xf32>
    %58 = arith.mulf %56, %57 : vector<8x8xf32>
    %cst_41 = arith.constant 3.200000e-15 : f32
    %59 = vector.broadcast %cst_41 : f32 to vector<8x8xf32>
    %60 = arith.maximumf %58, %59 : vector<8x8xf32>
    %61 = math.rsqrt %60 : vector<8x8xf32>
    %62 = arith.mulf %46, %61 : vector<8x8xf32>
    %cst_42 = arith.constant dense<0xFF800000> : vector<8xf32>
    %63 = vector.multi_reduction <maximumf>, %62, %cst_42 [1] : vector<8x8xf32> to vector<8xf32>
    %64 = vector.shape_cast %63 : vector<8xf32> to vector<8x1xf32>
    %65 = vector.broadcast %64 : vector<8x1xf32> to vector<8x8xf32>
    %66 = arith.subf %62, %65 : vector<8x8xf32>
    %67 = math.exp %66 : vector<8x8xf32>
    %cst_43 = arith.constant dense<0.000000e+00> : vector<8xf32>
    %68 = vector.multi_reduction <add>, %67, %cst_43 [1] : vector<8x8xf32> to vector<8xf32>
    %69 = vector.shape_cast %68 : vector<8xf32> to vector<8x1xf32>
    %70 = tpu.reciprocal %69 {approx = true} : vector<8x1xf32> -> vector<8x1xf32>
    %71 = vector.broadcast %70 : vector<8x1xf32> to vector<8x8xf32>
    %72 = arith.mulf %67, %71 : vector<8x8xf32>
    %cst_44 = arith.constant dense<0.000000e+00> : vector<8x32xf32>
    %73 = tpu.matmul %72, %45, %cst_44 {dimension_numbers = #tpu.dot_dimension_numbers<[1], [0], [0], [1], [0, 0, 1, 1], [], []>} : vector<8x8xf32>, vector<8x32xf32>, vector<8x32xf32> -> vector<8x32xf32>
    %c0_45 = arith.constant 0 : index
    %c1_46 = arith.constant 1 : index
    %c0_47 = arith.constant 0 : index
    %c0_48 = arith.constant 0 : index
    %74 = vector.load %arg6[%c0_45, %c1_46, %c0_47, %c0_48] : memref<1x4x8x32xf32, #tpu.memory_space<vmem>>, vector<1x1x8x32xf32>
    %75 = vector.shape_cast %74 : vector<1x1x8x32xf32> to vector<8x32xf32>
    %76 = vector.shape_cast %73 : vector<8x32xf32> to vector<1x1x8x32xf32>
    tpu.vector_store %arg6[%c0_45, %c1_46, %c0_47, %c0_48], %76 {strides = array<i32>} : memref<1x4x8x32xf32, #tpu.memory_space<vmem>>, vector<1x1x8x32xf32>,
    %c0_49 = arith.constant 0 : index
    %c1_50 = arith.constant 1 : index
    %c0_51 = arith.constant 0 : index
    %c0_52 = arith.constant 0 : index
    %77 = vector.load %arg7[%c0_49, %c1_50, %c0_51, %c0_52] : memref<1x4x8x8xf32, #tpu.memory_space<vmem>>, vector<1x1x8x8xf32>
    %78 = vector.shape_cast %77 : vector<1x1x8x8xf32> to vector<8x8xf32>
    %79 = vector.shape_cast %72 : vector<8x8xf32> to vector<1x1x8x8xf32>
    tpu.vector_store %arg7[%c0_49, %c1_50, %c0_51, %c0_52], %79 {strides = array<i32>} : memref<1x4x8x8xf32, #tpu.memory_space<vmem>>, vector<1x1x8x8xf32>,
    %c0_53 = arith.constant 0 : index
    %c0_54 = arith.constant 0 : index
    %c2 = arith.constant 2 : index
    %c0_55 = arith.constant 0 : index
    %80 = vector.load %arg3[%c0_53, %c0_54, %c2, %c0_55] : memref<1x8x4x32xf32, #tpu.memory_space<vmem>>, vector<1x8x1x32xf32>
    %81 = vector.shape_cast %80 : vector<1x8x1x32xf32> to vector<8x32xf32>
    %c0_56 = arith.constant 0 : index
    %c0_57 = arith.constant 0 : index
    %c2_58 = arith.constant 2 : index
    %c0_59 = arith.constant 0 : index
    %82 = vector.load %arg4[%c0_56, %c0_57, %c2_58, %c0_59] : memref<1x8x4x32xf32, #tpu.memory_space<vmem>>, vector<1x8x1x32xf32>
    %83 = vector.shape_cast %82 : vector<1x8x1x32xf32> to vector<8x32xf32>
    %c0_60 = arith.constant 0 : index
    %c0_61 = arith.constant 0 : index
    %c2_62 = arith.constant 2 : index
    %c0_63 = arith.constant 0 : index
    %84 = vector.load %arg5[%c0_60, %c0_61, %c2_62, %c0_63] : memref<1x8x4x32xf32, #tpu.memory_space<vmem>>, vector<1x8x1x32xf32>
    %85 = vector.shape_cast %84 : vector<1x8x1x32xf32> to vector<8x32xf32>
    %cst_64 = arith.constant dense<0.000000e+00> : vector<8x8xf32>
    %86 = tpu.matmul %81, %83, %cst_64 {dimension_numbers = #tpu.dot_dimension_numbers<[1], [1], [0], [0], [0, 0, 1, 0], [], []>} : vector<8x32xf32>, vector<8x32xf32>, vector<8x8xf32> -> vector<8x8xf32>
    %87 = arith.mulf %81, %81 : vector<8x32xf32>
    %cst_65 = arith.constant dense<0.000000e+00> : vector<8xf32>
    %88 = vector.multi_reduction <add>, %87, %cst_65 [1] : vector<8x32xf32> to vector<8xf32>
    %89 = vector.shape_cast %88 : vector<8xf32> to vector<8x1xf32>
    %cst_66 = arith.constant 3.200000e+01 : f32
    %90 = vector.broadcast %cst_66 : f32 to vector<8x1xf32>
    %91 = arith.mulf %89, %90 : vector<8x1xf32>
    %92 = arith.mulf %83, %83 : vector<8x32xf32>
    %cst_67 = arith.constant dense<0.000000e+00> : vector<8xf32>
    %93 = vector.multi_reduction <add>, %92, %cst_67 [1] : vector<8x32xf32> to vector<8xf32>
    %94 = vector.shape_cast %93 : vector<8xf32> to vector<8x1xf32>
    %95 = tpu.transpose %94, [1, 0] : vector<8x1xf32> -> vector<1x8xf32>
    %96 = vector.broadcast %91 : vector<8x1xf32> to vector<8x8xf32>
    %97 = vector.broadcast %95 : vector<1x8xf32> to vector<8x8xf32>
    %98 = arith.mulf %96, %97 : vector<8x8xf32>
    %cst_68 = arith.constant 3.200000e-15 : f32
    %99 = vector.broadcast %cst_68 : f32 to vector<8x8xf32>
    %100 = arith.maximumf %98, %99 : vector<8x8xf32>
    %101 = math.rsqrt %100 : vector<8x8xf32>
    %102 = arith.mulf %86, %101 : vector<8x8xf32>
    %cst_69 = arith.constant dense<0xFF800000> : vector<8xf32>
    %103 = vector.multi_reduction <maximumf>, %102, %cst_69 [1] : vector<8x8xf32> to vector<8xf32>
    %104 = vector.shape_cast %103 : vector<8xf32> to vector<8x1xf32>
    %105 = vector.broadcast %104 : vector<8x1xf32> to vector<8x8xf32>
    %106 = arith.subf %102, %105 : vector<8x8xf32>
    %107 = math.exp %106 : vector<8x8xf32>
    %cst_70 = arith.constant dense<0.000000e+00> : vector<8xf32>
    %108 = vector.multi_reduction <add>, %107, %cst_70 [1] : vector<8x8xf32> to vector<8xf32>
    %109 = vector.shape_cast %108 : vector<8xf32> to vector<8x1xf32>
    %110 = tpu.reciprocal %109 {approx = true} : vector<8x1xf32> -> vector<8x1xf32>
    %111 = vector.broadcast %110 : vector<8x1xf32> to vector<8x8xf32>
    %112 = arith.mulf %107, %111 : vector<8x8xf32>
    %cst_71 = arith.constant dense<0.000000e+00> : vector<8x32xf32>
    %113 = tpu.matmul %112, %85, %cst_71 {dimension_numbers = #tpu.dot_dimension_numbers<[1], [0], [0], [1], [0, 0, 1, 1], [], []>} : vector<8x8xf32>, vector<8x32xf32>, vector<8x32xf32> -> vector<8x32xf32>
    %c0_72 = arith.constant 0 : index
    %c2_73 = arith.constant 2 : index
    %c0_74 = arith.constant 0 : index
    %c0_75 = arith.constant 0 : index
    %114 = vector.load %arg6[%c0_72, %c2_73, %c0_74, %c0_75] : memref<1x4x8x32xf32, #tpu.memory_space<vmem>>, vector<1x1x8x32xf32>
    %115 = vector.shape_cast %114 : vector<1x1x8x32xf32> to vector<8x32xf32>
    %116 = vector.shape_cast %113 : vector<8x32xf32> to vector<1x1x8x32xf32>
    tpu.vector_store %arg6[%c0_72, %c2_73, %c0_74, %c0_75], %116 {strides = array<i32>} : memref<1x4x8x32xf32, #tpu.memory_space<vmem>>, vector<1x1x8x32xf32>,
    %c0_76 = arith.constant 0 : index
    %c2_77 = arith.constant 2 : index
    %c0_78 = arith.constant 0 : index
    %c0_79 = arith.constant 0 : index
    %117 = vector.load %arg7[%c0_76, %c2_77, %c0_78, %c0_79] : memref<1x4x8x8xf32, #tpu.memory_space<vmem>>, vector<1x1x8x8xf32>
    %118 = vector.shape_cast %117 : vector<1x1x8x8xf32> to vector<8x8xf32>
    %119 = vector.shape_cast %112 : vector<8x8xf32> to vector<1x1x8x8xf32>
    tpu.vector_store %arg7[%c0_76, %c2_77, %c0_78, %c0_79], %119 {strides = array<i32>} : memref<1x4x8x8xf32, #tpu.memory_space<vmem>>, vector<1x1x8x8xf32>,
    %c0_80 = arith.constant 0 : index
    %c0_81 = arith.constant 0 : index
    %c3 = arith.constant 3 : index
    %c0_82 = arith.constant 0 : index
    %120 = vector.load %arg3[%c0_80, %c0_81, %c3, %c0_82] : memref<1x8x4x32xf32, #tpu.memory_space<vmem>>, vector<1x8x1x32xf32>
    %121 = vector.shape_cast %120 : vector<1x8x1x32xf32> to vector<8x32xf32>
    %c0_83 = arith.constant 0 : index
    %c0_84 = arith.constant 0 : index
    %c3_85 = arith.constant 3 : index
    %c0_86 = arith.constant 0 : index
    %122 = vector.load %arg4[%c0_83, %c0_84, %c3_85, %c0_86] : memref<1x8x4x32xf32, #tpu.memory_space<vmem>>, vector<1x8x1x32xf32>
    %123 = vector.shape_cast %122 : vector<1x8x1x32xf32> to vector<8x32xf32>
    %c0_87 = arith.constant 0 : index
    %c0_88 = arith.constant 0 : index
    %c3_89 = arith.constant 3 : index
    %c0_90 = arith.constant 0 : index
    %124 = vector.load %arg5[%c0_87, %c0_88, %c3_89, %c0_90] : memref<1x8x4x32xf32, #tpu.memory_space<vmem>>, vector<1x8x1x32xf32>
    %125 = vector.shape_cast %124 : vector<1x8x1x32xf32> to vector<8x32xf32>
    %cst_91 = arith.constant dense<0.000000e+00> : vector<8x8xf32>
    %126 = tpu.matmul %121, %123, %cst_91 {dimension_numbers = #tpu.dot_dimension_numbers<[1], [1], [0], [0], [0, 0, 1, 0], [], []>} : vector<8x32xf32>, vector<8x32xf32>, vector<8x8xf32> -> vector<8x8xf32>
    %127 = arith.mulf %121, %121 : vector<8x32xf32>
    %cst_92 = arith.constant dense<0.000000e+00> : vector<8xf32>
    %128 = vector.multi_reduction <add>, %127, %cst_92 [1] : vector<8x32xf32> to vector<8xf32>
    %129 = vector.shape_cast %128 : vector<8xf32> to vector<8x1xf32>
    %cst_93 = arith.constant 3.200000e+01 : f32
    %130 = vector.broadcast %cst_93 : f32 to vector<8x1xf32>
    %131 = arith.mulf %129, %130 : vector<8x1xf32>
    %132 = arith.mulf %123, %123 : vector<8x32xf32>
    %cst_94 = arith.constant dense<0.000000e+00> : vector<8xf32>
    %133 = vector.multi_reduction <add>, %132, %cst_94 [1] : vector<8x32xf32> to vector<8xf32>
    %134 = vector.shape_cast %133 : vector<8xf32> to vector<8x1xf32>
    %135 = tpu.transpose %134, [1, 0] : vector<8x1xf32> -> vector<1x8xf32>
    %136 = vector.broadcast %131 : vector<8x1xf32> to vector<8x8xf32>
    %137 = vector.broadcast %135 : vector<1x8xf32> to vector<8x8xf32>
    %138 = arith.mulf %136, %137 : vector<8x8xf32>
    %cst_95 = arith.constant 3.200000e-15 : f32
    %139 = vector.broadcast %cst_95 : f32 to vector<8x8xf32>
    %140 = arith.maximumf %138, %139 : vector<8x8xf32>
    %141 = math.rsqrt %140 : vector<8x8xf32>
    %142 = arith.mulf %126, %141 : vector<8x8xf32>
    %cst_96 = arith.constant dense<0xFF800000> : vector<8xf32>
    %143 = vector.multi_reduction <maximumf>, %142, %cst_96 [1] : vector<8x8xf32> to vector<8xf32>
    %144 = vector.shape_cast %143 : vector<8xf32> to vector<8x1xf32>
    %145 = vector.broadcast %144 : vector<8x1xf32> to vector<8x8xf32>
    %146 = arith.subf %142, %145 : vector<8x8xf32>
    %147 = math.exp %146 : vector<8x8xf32>
    %cst_97 = arith.constant dense<0.000000e+00> : vector<8xf32>
    %148 = vector.multi_reduction <add>, %147, %cst_97 [1] : vector<8x8xf32> to vector<8xf32>
    %149 = vector.shape_cast %148 : vector<8xf32> to vector<8x1xf32>
    %150 = tpu.reciprocal %149 {approx = true} : vector<8x1xf32> -> vector<8x1xf32>
    %151 = vector.broadcast %150 : vector<8x1xf32> to vector<8x8xf32>
    %152 = arith.mulf %147, %151 : vector<8x8xf32>
    %cst_98 = arith.constant dense<0.000000e+00> : vector<8x32xf32>
    %153 = tpu.matmul %152, %125, %cst_98 {dimension_numbers = #tpu.dot_dimension_numbers<[1], [0], [0], [1], [0, 0, 1, 1], [], []>} : vector<8x8xf32>, vector<8x32xf32>, vector<8x32xf32> -> vector<8x32xf32>
    %c0_99 = arith.constant 0 : index
    %c3_100 = arith.constant 3 : index
    %c0_101 = arith.constant 0 : index
    %c0_102 = arith.constant 0 : index
    %154 = vector.load %arg6[%c0_99, %c3_100, %c0_101, %c0_102] : memref<1x4x8x32xf32, #tpu.memory_space<vmem>>, vector<1x1x8x32xf32>
    %155 = vector.shape_cast %154 : vector<1x1x8x32xf32> to vector<8x32xf32>
    %156 = vector.shape_cast %153 : vector<8x32xf32> to vector<1x1x8x32xf32>
    tpu.vector_store %arg6[%c0_99, %c3_100, %c0_101, %c0_102], %156 {strides = array<i32>} : memref<1x4x8x32xf32, #tpu.memory_space<vmem>>, vector<1x1x8x32xf32>,
    %c0_103 = arith.constant 0 : index
    %c3_104 = arith.constant 3 : index
    %c0_105 = arith.constant 0 : index
    %c0_106 = arith.constant 0 : index
    %157 = vector.load %arg7[%c0_103, %c3_104, %c0_105, %c0_106] : memref<1x4x8x8xf32, #tpu.memory_space<vmem>>, vector<1x1x8x8xf32>
    %158 = vector.shape_cast %157 : vector<1x1x8x8xf32> to vector<8x8xf32>
    %159 = vector.shape_cast %152 : vector<8x8xf32> to vector<1x1x8x8xf32>
    tpu.vector_store %arg7[%c0_103, %c3_104, %c0_105, %c0_106], %159 {strides = array<i32>} : memref<1x4x8x8xf32, #tpu.memory_space<vmem>>, vector<1x1x8x8xf32>,
    return
  }
  func.func @transform_0(%arg0: i32, %arg1: i32, %arg2: i32) -> (i32, i32, i32, i32) {
    %c0_i32 = arith.constant 0 : i32
    %c0_i32_0 = arith.constant 0 : i32
    return %arg0, %arg2, %arg1, %c0_i32 : i32, i32, i32, i32
  }
  func.func @transform_1(%arg0: i32, %arg1: i32, %arg2: i32) -> (i32, i32, i32, i32) {
    %c0_i32 = arith.constant 0 : i32
    %c0_i32_0 = arith.constant 0 : i32
    %c0_i32_1 = arith.constant 0 : i32
    return %arg0, %c0_i32, %arg1, %c0_i32_0 : i32, i32, i32, i32
  }
  func.func @transform_2(%arg0: i32, %arg1: i32, %arg2: i32) -> (i32, i32, i32, i32) {
    %c0_i32 = arith.constant 0 : i32
    %c0_i32_0 = arith.constant 0 : i32
    %c0_i32_1 = arith.constant 0 : i32
    return %arg0, %c0_i32, %arg1, %c0_i32_0 : i32, i32, i32, i32
  }
  func.func @transform_3(%arg0: i32, %arg1: i32, %arg2: i32) -> (i32, i32, i32, i32) {
    %c0_i32 = arith.constant 0 : i32
    %c0_i32_0 = arith.constant 0 : i32
    return %arg0, %arg1, %arg2, %c0_i32 : i32, i32, i32, i32
  }
  func.func @transform_4(%arg0: i32, %arg1: i32, %arg2: i32) -> (i32, i32, i32, i32) {
    %c0_i32 = arith.constant 0 : i32
    %c0_i32_0 = arith.constant 0 : i32
    return %arg0, %arg1, %arg2, %c0_i32 : i32, i32, i32, i32
  }
}

</mosaic_0001>

<bundles_post_ra>
// kernel: tpu_custom_call.1
= control target key start
LH: loop header
LB: loop body
LE: loop exit
PB: predicated region body
PF: predicated region fallthrough
CT: control target
= control target key end

     0   :  { %s3431_s0 = inlined_call_operand.hbm [shape: f32[2,8,4,32], index: 0, kind: input, shape index: {}]   ;;  %s3432_s1 = inlined_call_operand.hbm [shape: f32[2,8,4,32], index: 1, kind: input, shape index: {}]   ;;  %s3433_s2 = inlined_call_operand.hbm [shape: f32[2,8,4,32], index: 2, kind: input, shape index: {}]   ;;  %s3434_s3 = inlined_call_operand.hbm [shape: f32[2,4,8,32], index: 3, kind: output, shape index: {0}]   ;;  %s3435_s4 = inlined_call_operand.hbm [shape: f32[2,4,8,8], index: 4, kind: output, shape index: {1}]  }
   0x1   :  { %3461 = sst [smem:[#allocation30_spill]] %s3432_s1 }
   0x2   :  { %10 = vsyncpa [#allocation3], 0 }
   0x3   :  { %12 = vsyncpa [#allocation3 + $0x1], 0 }
   0x4   :  { %13 = vsyncpa [#allocation6], 0 }
   0x5   :  { %15 = vsyncpa [#allocation6 + $0x1], 0 }
   0x6   :  { %16 = vsyncpa [#allocation4], 0 }
   0x7   :  { %18 = vsyncpa [#allocation4 + $0x1], 0 }
   0x8   :  { %19 = vsyncpa [#allocation10], 0 }
   0x9   :  { %21 = vsyncpa [#allocation10 + $0x1], 0  ;;  %s2477_s15 = smov 0   ;;  %s2479_s16 = smov 0  }
   0xa   :  { %s2481_s17 = smov 0   ;;  %s2483_s18 = smov 0  }
   0xb   :  { %s2485_s19 = smov 0   ;;  %s2487_s20 = smov 0  }
   0xc LB: > { %3462 = sst [smem:[#allocation15_spill]] %s2435_s19  ;;  %s2508_s21 = sadd.s32 4294967295, %s2439_s20   ;;  %s2439_s20 = sphi %s2487_s20, %s27_s20   ;;  %s2435_s19 = sphi %s2485_s19, %s3522_s19   ;;  %s2431_s18 = sphi %s2483_s18, %s3521_s18   ;;  %s2427_s17 = sphi %s2481_s17, %s3525_s17   ;;  %s2423_s16 = sphi %s2479_s16, %s3524_s16   ;;  %s2419_s15 = sphi %s2477_s15, %s3523_s15  }
   0xd   : > { %3463 = sst [smem:[#allocation16_spill]] %s2439_s20  ;;  %s2019_s22 = sadd.s32 4294967294, %s2439_s20  }
   0xe   : > { %s46_s23 = sadd.s32 1, %s2435_s19  ;;  %s57_s24 = sadd.s32 1, %s2427_s17 }
   0xf   : > { %p48_p0 = scmp.ge.s32.totalorder %s46_s23, 2  ;;  %p64_p1 = scmp.ne.s32.totalorder %s2427_s17, %s2423_s16 }
  0x10   : > { %p65_p2 = scmp.eq.s32.totalorder %s2439_s20, 0  ;;  %p70_p3 = scmp.ne.s32.totalorder %s2423_s16, %s2419_s15 }
  0x11   : > { %s3527_s23 = smov (%p48_p0, %s46_s23), 0  ;;  %p71_p5 = scmp.eq.s32.totalorder %s2508_s21, 0 }
  0x12   : > { %3464 = sst [smem:[#allocation17_spill]] %s3527_s23  ;;  %p2520_p4 = por %p65_p2, %p64_p1 }
  0x13   : > { %s50_s26 = ssub.s32 %s2435_s19, %s3527_s23  ;;  %p154_p6 = scmp.eq.s32.totalorder %s2508_s21, 1 }
  0x14   : > { %p55_p7 = scmp.eq.s32.totalorder %s50_s26, 0  ;;  %p2528_p8 = por %p71_p5, %p70_p3 }
  0x15   : > { %p2532_p9 = por %p154_p6, %p64_p1  ;;  %p160_p10 = scmp.eq.s32.totalorder %s2019_s22, 1 }
  0x16   : > { %s3466_s27 = scalar_select %p2528_p8, 1, 0 }
  0x17   : > { %s3467_s28 = scalar_select %p2532_p9, 1, 0 }
  0x18   : > { %s2537_s29 = scalar_select %p55_p7, %s2427_s17, %s57_s24  }
  0x19   : > { %p2539_p11 = por %p160_p10, %p70_p3  ;;  %p2151_p13 = scmp.lt.s32.totalorder %s2439_s20, 2 }
  0x1a   : > { %3468 = sst [smem:[#allocation18_spill]] %s2537_s29  ;;  %s3436_s5 = sand.u32 1, %s2427_s17  }
  0x1b   : > { %s3469_s30 = scalar_select %p2539_p11, 1, 0 }
  0x1c   : > { %s2548_s6 = sshll.u32 %s3436_s5, 5  ;;  %s2551_s7 = sshll.u32 %s2435_s19, 9 }
  0x1d   : > { %p2555_p0 = pnand %p2151_p13, %p2520_p4  ;;  %s234_s9 = sand.u32 1, %s2439_s20  }
  0x1e   : > { %s3471_s1 = sld [smem:[#allocation30_spill]]  ;;  %s238_s13 = scalar_lea.vmem [#allocation5], %s2548_s6 }
  0x1f   : > { %s246_s14 = sshll.u32 %s238_s13, 4  ;;  %s2571_s22 = scalar_lea.sflag [#allocation6], %s234_s9  ;;  %s2568_s14 = int_to_ptr.vmem [resolvable:$true] %s246_s14 }
  0x20   : > { %p2577_p4 = pneg %p2555_p0 }
  0x24   : > { %s2564_s12 = scalar_lea.hbm %s3471_s1, %s2551_s7  ;;  %s2236_s11 = scalar_lea.hbm %s3471_s1, 1024 }
  0x25   : > { %s2231_s24 = scalar_lea.hbm %s2564_s12, 512  ;;  %p2237_p7 = scmp.lt.u32.totalorder %s2564_s12, %s3471_s1 }
  0x26   : > { %p2232_p3 = scmp.ne.s32.totalorder %s2564_s12, %s2231_s24  ;;  %p2238_p10 = scmp.lt.u32.totalorder %s2236_s11, %s2231_s24 }
  0x27   : > { %p2240_p12 = scmp.lt.u32.totalorder %s2231_s24, %s2564_s12 }
  0x28   : > { %p2234_p5 = pnand %p2577_p4, %p2232_p3  ;;  %p2239_p13 = por %p2238_p10, %p2237_p7 }
  0x2a   : > { %p2235_p6 = pneg %p2234_p5  ;;  %p2241_p1 = por %p2240_p12, %p2239_p13 }
  0x2c   : > { %p2242_p2 = pnand %p2241_p1, %p2235_p6 }
  0x2e   : > { %2245 = shalt.err (!%p2242_p2)
}
  0x2f   : > { %s2246_s9 = scalar_lea.vmem %s2568_s14, 512  ;;  %s2441_s26 = smov [#allocation5]  }
  0x30   : > { %p2247_p3 = scmp.ne.s32.totalorder %s2568_s14, %s2246_s9  ;;  %s2251_s10 = sshll.u32 %s2441_s26, 4  ;;  %s2252_s10 = int_to_ptr.vmem [resolvable:$false] %s2251_s10 }
  0x31   : > { %s2253_s5 = scalar_lea.vmem %s2252_s10, 1024  ;;  %p2254_p9 = scmp.lt.s32.totalorder %s2568_s14, %s2252_s10 }
  0x32   : > { %p2249_p5 = pnand %p2247_p3, %p2577_p4  ;;  %p2255_p8 = scmp.lt.s32.totalorder %s2253_s5, %s2246_s9 }
  0x34   : > { %p2250_p11 = pneg %p2249_p5  ;;  %p2256_p7 = por %p2255_p8, %p2254_p9 }
  0x36   : > { %p2257_p10 = pnand %p2256_p7, %p2250_p11 }
  0x38   : > { %2260 = shalt.err (!%p2257_p10)
}
  0x39   : > { %s3439_s24 = smov 64   ;;  %s3441_s11 = smov 4  }
  0x3a   : > { %2140 = dma.hbm_to_vmem [thread:$0]  (!%p2555_p0), %s2564_s12, 512, %s2568_s14, %s2571_s22, %s3439_s24, %s3439_s24, %s3441_s11  }
  0x3b   : > { %p3473_p8 = scmp.lt.s32.totalorder %s2439_s20, 3  ;;  %p3474_p9 = scmp.ge.s32.totalorder %s2439_s20, 1 }
  0x3c   : > { %s2616_s10 = scalar_lea.hbm %s3431_s0, %s2551_s7  ;;  %s214_s5 = scalar_lea.vmem [#allocation2], %s2548_s6 }
  0x3d   : > { %p2608_p11 = pnand %p3474_p9, %p3473_p8  ;;  %s224_s1 = sshll.u32 %s214_s5, 4  ;;  %s2619_s1 = int_to_ptr.vmem [resolvable:$true] %s224_s1 }
  0x3e   : > { %s2625_s24 = scalar_lea.hbm %s3433_s2, %s2551_s7  ;;  %s3476_s11 = sand.u32 1, %s2427_s17  }
  0x3f   : > { %s3475_s13 = scalar_select %p2608_p11, 1, 0 }
  0x40   : > { %s2629_s23 = scalar_lea.sflag [#allocation3], %s3476_s11  ;;  %s2261_s19 = scalar_lea.hbm %s2616_s10, 512 }
  0x41   : > { %p2262_p12 = scmp.ne.s32.totalorder %s2616_s10, %s2261_s19  ;;  %s2266_s29 = scalar_lea.hbm %s3431_s0, 1024 }
  0x42   : > { %p2267_p6 = scmp.lt.u32.totalorder %s2616_s10, %s3431_s0  ;;  %p2268_p13 = scmp.lt.u32.totalorder %s2266_s29, %s2261_s19 }
  0x43   : > { %p2264_p1 = pnand %p2262_p12, %p2577_p4  ;;  %p2270_p5 = scmp.lt.u32.totalorder %s2261_s19, %s2616_s10 }
  0x44   : > { %p2269_p3 = por %p2268_p13, %p2267_p6 }
  0x45   : > { %p2265_p2 = pneg %p2264_p1 }
  0x46   : > { %p2271_p7 = por %p2270_p5, %p2269_p3 }
  0x48   : > { %p2272_p10 = pnand %p2271_p7, %p2265_p2 }
  0x4a   : > { %2275 = shalt.err (!%p2272_p10)
}
  0x4b   : > { %s2276_s7 = scalar_lea.vmem %s2619_s1, 512  ;;  %s2444_s11 = smov [#allocation2]  }
  0x4c   : > { %p2277_p8 = scmp.ne.s32.totalorder %s2619_s1, %s2276_s7  ;;  %s2281_s12 = sshll.u32 %s2444_s11, 4  ;;  %s2282_s12 = int_to_ptr.vmem [resolvable:$false] %s2281_s12 }
  0x4d   : > { %s2283_s20 = scalar_lea.vmem %s2282_s12, 1024  ;;  %p2284_p1 = scmp.lt.s32.totalorder %s2619_s1, %s2282_s12 }
  0x4e   : > { %p2279_p9 = pnand %p2277_p8, %p2577_p4  ;;  %p2285_p11 = scmp.lt.s32.totalorder %s2283_s20, %s2276_s7 }
  0x50   : > { %p2280_p12 = pneg %p2279_p9  ;;  %p2286_p6 = por %p2285_p11, %p2284_p1 }
  0x52   : > { %p2287_p13 = pnand %p2286_p6, %p2280_p12 }
  0x54   : > { %2290 = shalt.err (!%p2287_p13)
}
  0x55   : > { %s3477_s19 = smov 4   ;;  %s3478_s29 = smov 64  }
  0x56   : > { %2137 = dma.hbm_to_vmem [thread:$0]  (!%p2555_p0), %s2616_s10, 512, %s2619_s1, %s2629_s23, %s3478_s29, %s3478_s29, %s3477_s19  }
  0x57   : > { %s260_s14 = scalar_lea.vmem [#allocation7], %s2548_s6  ;;  %s2291_s26 = scalar_lea.hbm %s2625_s24, 512 }
  0x58   : > { %s268_s9 = sshll.u32 %s260_s14, 4  ;;  %p2292_p11 = scmp.ne.s32.totalorder %s2625_s24, %s2291_s26  ;;  %s2657_s9 = int_to_ptr.vmem [resolvable:$true] %s268_s9 }
  0x59   : > { %s2296_s11 = scalar_lea.hbm %s3433_s2, 1024  ;;  %p2297_p5 = scmp.lt.u32.totalorder %s2625_s24, %s3433_s2 }
  0x5a   : > { %p2294_p2 = pnand %p2292_p11, %p2577_p4  ;;  %p2298_p7 = scmp.lt.u32.totalorder %s2296_s11, %s2291_s26 }
  0x5b   : > { %p2300_p8 = scmp.lt.u32.totalorder %s2291_s26, %s2625_s24 }
  0x5c   : > { %p2295_p3 = pneg %p2294_p2  ;;  %p2299_p10 = por %p2298_p7, %p2297_p5 }
  0x5e   : > { %p2301_p9 = por %p2300_p8, %p2299_p10 }
  0x60   : > { %p2302_p12 = pnand %p2301_p9, %p2295_p3 }
  0x62   : > { %2305 = shalt.err (!%p2302_p12)
}
  0x63   : > { %s2306_s1 = scalar_lea.vmem %s2657_s9, 512  ;;  %s2445_s23 = smov [#allocation7]  }
  0x64   : > { %p2307_p1 = scmp.ne.s32.totalorder %s2657_s9, %s2306_s1  ;;  %s2311_s6 = sshll.u32 %s2445_s23, 4  ;;  %s2312_s6 = int_to_ptr.vmem [resolvable:$false] %s2311_s6 }
  0x65   : > { %s2313_s10 = scalar_lea.vmem %s2312_s6, 1024  ;;  %p2314_p11 = scmp.lt.s32.totalorder %s2657_s9, %s2312_s6 }
  0x66   : > { %p2309_p6 = pnand %p2307_p1, %p2577_p4  ;;  %p2315_p2 = scmp.lt.s32.totalorder %s2313_s10, %s2306_s1 }
  0x68   : > { %p2310_p13 = pneg %p2309_p6  ;;  %p2316_p5 = por %p2315_p2, %p2314_p11 }
  0x6a   : > { %p2317_p7 = pnand %p2316_p5, %p2310_p13 }
  0x6c   : > { %2320 = shalt.err (!%p2317_p7)
}
  0x6d   : > { %2143 = dma.hbm_to_vmem [thread:$0]  (!%p2555_p0), %s2625_s24, 512, %s2657_s9, %s2571_s22, %s3478_s29, %s3478_s29, %s3477_s19  }
  0x6e   : > { %p3479_p4 = scmp.ne.s32.totalorder %s3475_s13, 0 }
  0x70   : > { %280 = sbr.rel (%p3479_p4) target bundleno = 1511 (0x5e7), region = 32 }
  0x77   : > { %s2687_s25 = sand.u32 1, %s2423_s16   ;;  %p3480_p3 = scmp.ne.s32.totalorder %s3466_s27, 0 }
  0x78   : > { %s2690_s14 = sshll.u32 %s2687_s25, 5  ;;  %s283_s8 = scalar_lea.sflag [#allocation3], %s2687_s25 }
  0x79   : > { %s2694_s26 = scalar_lea.vmem [#allocation2], %s2690_s14 }
  0x7a   : > { %2402 = dma.done.wait (%p3480_p3), %s283_s8, 512  }
  0x7b   : > { %2404 = vsyncadd (%p3480_p3), %s283_s8, 4294966784  ;;  %s291_s22 = sand.u32 1, %s2508_s21   ;;  %s2702_s13 = scalar_lea.vmem [#allocation5], %s2690_s14 }
  0x7c   : > { %s292_s24 = scalar_lea.sflag [#allocation6], %s291_s22 }
  0x7d   : > { %2406 = dma.done.wait (%p3480_p3), %s292_s24, 1024  }
  0x7e   : > { %2408 = vsyncadd (%p3480_p3), %s292_s24, 4294966272  ;;  %v3447_v0 = vmov 0.0   ;;  %vm2447_vm0 = vmmov 0   ;;  %vm380_vm1 = vcmask 1041409   ;;  %vm383_vm2 = vcmask 1042434   ;;  %s3077_s21 = scalar_lea.vmem [#allocation7], %s2690_s14 }
  0x7f   : > { %2084 = vmatprep.subr.mxu0 %v3447_v0  ;;  %2086 = vmatprep.mubr.msk.f32.mxu0 %vm2447_vm0, %v3447_v0  ;;  %vm386_vm3 = vcmask 1043459   ;;  %vm389_vm4 = vcmask 1044484   ;;  %vm392_vm5 = vcmask 1045509   ;;  %vm395_vm6 = vcmask 1046534   ;;  %v355_v1 = vld [vmem:[%s2702_s13] sm:$0x1] }
  0x80   : > { %2089 = vmatprep.subr.mxu1 %v3447_v0  ;;  %2091 = vmatprep.mubr.msk.f32.mxu1 %vm2447_vm0, %v3447_v0  ;;  %v356_v2 = vld [vmem:[%s2702_s13 + $0x4] sm:$0x1]  ;;  %v357_v3 = vld [vmem:[%s2702_s13 + $0x8] sm:$0x1]  ;;  %vm398_vm7 = vcmask 1047559   ;;  %vm422_vm8 = vcmask 261120   ;;  %v532_v7 = vmul.f32 %v355_v1, %v355_v1 }
  0x81   : > { %v358_v4 = vld [vmem:[%s2702_s13 + $0xc] sm:$0x1]  ;;  %v359_v5 = vld [vmem:[%s2702_s13 + $0x10] sm:$0x1]  ;;  %v360_v6 = vld [vmem:[%s2702_s13 + $0x14] sm:$0x1]  ;;  %v533_v8 = vmul.f32 %v356_v2, %v356_v2  ;;  %v534_v9 = vmul.f32 %v357_v3, %v357_v3 }
  0x82   : > { %v361_v10 = vld [vmem:[%s2702_s13 + $0x18] sm:$0x1]  ;;  %v362_v11 = vld [vmem:[%s2702_s13 + $0x1c] sm:$0x1]  ;;  %v535_v12 = vmul.f32 %v358_v4, %v358_v4  ;;  %v536_v13 = vmul.f32 %v359_v5, %v359_v5  ;;  %v537_v14 = vmul.f32 %v360_v6, %v360_v6  ;;  %v408_v15 = vrot.slane %v356_v2, 7  ;;  %s3223_s27 = scalar_lea.vmem [#allocation9], %s2690_s14 }
  0x83   : > { %v538_v16 = vmul.f32 %v361_v10, %v361_v10  ;;  %v539_v17 = vmul.f32 %v362_v11, %v362_v11  ;;  %v548_v18 = vrot.slane %v533_v8, 7  ;;  %v550_v19 = vrot.slane %v534_v9, 6  ;;  %v348_v20 = vld [vmem:[%s2694_s26 + $0x4] sm:$0x1]  ;;  %v349_v25 = vld [vmem:[%s2694_s26 + $0x8] sm:$0x1] }
  0x84   : > { %v552_v21 = vrot.slane %v535_v12, 5  ;;  %v554_v22 = vrot.slane %v536_v13, 4  ;;  %v556_v23 = vrot.slane %v537_v14, 3  ;;  %v409_v24 = vsel %vm380_vm1, %v408_v15, %v355_v1  ;;  %v350_v30 = vld [vmem:[%s2694_s26 + $0xc] sm:$0x1]  ;;  %s3245_s19 = scalar_lea.vmem [#allocation8], %s2690_s14 }
  0x85   : > { %v549_v26 = vsel %vm380_vm1, %v548_v18, %v532_v7  ;;  %v558_v27 = vrot.slane %v538_v16, 2  ;;  %v560_v28 = vrot.slane %v539_v17, 1  ;;  %v410_v29 = vrot.slane %v357_v3, 6  ;;  %v351_v35 = vld [vmem:[%s2694_s26 + $0x10] sm:$0x1]  ;;  %s2066_s29 = sshll.u32 %s2431_s18, 9 }
  0x86   : > { %v551_v31 = vsel %vm383_vm2, %v550_v19, %v549_v26  ;;  %v412_v32 = vrot.slane %v358_v4, 5  ;;  %v414_v33 = vrot.slane %v359_v5, 4  ;;  %v416_v34 = vrot.slane %v360_v6, 3  ;;  %v347_v40 = vld [vmem:[%s2694_s26] sm:$0x1]  ;;  %s1843_s9 = sshll.u32 %s3223_s27, 4  ;;  %s3334_s11 = scalar_lea.hbm %s3435_s4, %s2066_s29  ;;  %s3336_s9 = int_to_ptr.vmem [resolvable:$true] %s1843_s9 }
  0x87   : > { %v553_v36 = vsel %vm386_vm3, %v552_v21, %v551_v31  ;;  %v411_v37 = vsel %vm383_vm2, %v410_v29, %v409_v24  ;;  %v418_v38 = vrot.slane %v361_v10, 2  ;;  %v420_v39 = vrot.slane %v362_v11, 1  ;;  %v352_v41 = vld [vmem:[%s2694_s26 + $0x14] sm:$0x1]  ;;  %v353_v44 = vld [vmem:[%s2694_s26 + $0x18] sm:$0x1] }
  0x88   : > { %v555_v42 = vsel %vm389_vm4, %v554_v22, %v553_v36  ;;  %v413_v43 = vsel %vm386_vm3, %v412_v32, %v411_v37  ;;  %v379_v45 = vrot.slane %v348_v20, 7  ;;  %v382_v46 = vrot.slane %v349_v25, 6  ;;  %v354_v49 = vld [vmem:[%s2694_s26 + $0x1c] sm:$0x1]  ;;  %s1808_s12 = scalar_lea.sflag [#allocation10], %s2687_s25  ;;  %s2321_s20 = scalar_lea.vmem %s3336_s9, 512 }
  0x89   : > { %v557_v47 = vsel %vm392_vm5, %v556_v23, %v555_v42  ;;  %v415_v48 = vsel %vm389_vm4, %v414_v33, %v413_v43  ;;  %v385_v50 = vrot.slane %v350_v30, 5  ;;  %v388_v51 = vrot.slane %v351_v35, 4  ;;  %v2773_v43 = vld [vmem:[%s2702_s13 + $0x5] sm:$0x1]  ;;  %p2322_p0 = scmp.ne.s32.totalorder %s3336_s9, %s2321_s20  ;;  %p3516_p10 = scmp.ne.s32.totalorder %s3467_s28, 0 }
  0x8a   : > { %v559_v52 = vsel %vm395_vm6, %v558_v27, %v557_v47  ;;  %v417_v53 = vsel %vm392_vm5, %v416_v34, %v415_v48  ;;  %v381_v54 = vsel %vm380_vm1, %v379_v45, %v347_v40  ;;  %v391_v55 = vrot.slane %v352_v41, 3  ;;  %v2784_v47 = vld [vmem:[%s2702_s13 + $0xd] sm:$0x1]  ;;  %s2448_s1 = smov [#allocation9]  }
  0x8b   : > { %v561_v56 = vsel %vm398_vm7, %v560_v28, %v559_v52  ;;  %v419_v57 = vsel %vm395_vm6, %v418_v38, %v417_v53  ;;  %v384_v58 = vsel %vm383_vm2, %v382_v46, %v381_v54  ;;  %v394_v59 = vrot.slane %v353_v44, 2  ;;  %v2781_v46 = vld [vmem:[%s2702_s13 + $0x1] sm:$0x1]  ;;  %p2323_p8 = pnand %p2322_p0, %p3516_p10  ;;  %s2325_s23 = sshll.u32 %s2448_s1, 4  ;;  %s2326_s23 = int_to_ptr.vmem [resolvable:$false] %s2325_s23 }
  0x8c   : > { %v563_v60 = vsel %vm422_vm8, %v561_v56, 0.0  ;;  %v421_v61 = vsel %vm398_vm7, %v420_v39, %v419_v57  ;;  %v387_v62 = vsel %vm386_vm3, %v385_v50, %v384_v58  ;;  %v397_v63 = vrot.slane %v354_v49, 1  ;;  %v2800_v56 = vld [vmem:[%s2702_s13 + $0x15] sm:$0x1]  ;;  %s2327_s6 = scalar_lea.vmem %s2326_s23, 1024  ;;  %p2328_p12 = scmp.lt.s32.totalorder %s3336_s9, %s2326_s23 }
  0x8d   : > { %564 = vadd.xlane.f32.xlu0 %v563_v60  ;;  %2085 = vmatpush3.xpose.msk.msra.mxu0 %vm422_vm8, %v421_v61  ;;  %v390_v1 = vsel %vm389_vm4, %v388_v51, %v387_v62  ;;  %v497_v2 = vmul.f32 %v347_v40, %v347_v40  ;;  %v498_v3 = vmul.f32 %v348_v20, %v348_v20  ;;  %v598_v31 = vlaneseq  ;;  %v2791_v51 = vld [vmem:[%s2702_s13 + $0x11] sm:$0x1]  ;;  %v2806_v60 = vld [vmem:[%s2702_s13 + $0xa] sm:$0x1]  ;;  %v2811_v62 = vld [vmem:[%s2702_s13 + $0x19] sm:$0x1]  ;;  %p2324_p9 = pneg %p2323_p8  ;;  %p2329_p1 = scmp.lt.s32.totalorder %s2327_s6, %s2321_s20 }
  0x8e   : > { %v393_v4 = vsel %vm392_vm5, %v391_v55, %v390_v1  ;;  %v499_v5 = vmul.f32 %v349_v25, %v349_v25  ;;  %v500_v6 = vmul.f32 %v350_v30, %v350_v30  ;;  %v501_v7 = vmul.f32 %v351_v35, %v351_v35  ;;  %2099 = vmatprep.subr.mxu0 %v3447_v0  ;;  %v2797_v55 = vld [vmem:[%s2702_s13 + $0x6] sm:$0x1]  ;;  %v2816_v1 = vld [vmem:[%s2702_s13 + $0x2] sm:$0x1] }
  0x8f   : > { %v396_v8 = vsel %vm395_vm6, %v394_v59, %v393_v4  ;;  %v502_v9 = vmul.f32 %v352_v41, %v352_v41  ;;  %v503_v10 = vmul.f32 %v353_v44, %v353_v44  ;;  %v504_v11 = vmul.f32 %v354_v49, %v354_v49  ;;  %v2776_v44 = vld [vmem:[%s2702_s13 + $0x9] sm:$0x1]  ;;  %3482 = vst [vmem:[#allocation20_spill] sm:$0xff] %v2816_v1  ;;  %v2820_v4 = vld [vmem:[%s2702_s13 + $0xe] sm:$0x1]  ;;  %p2330_p6 = por %p2329_p1, %p2328_p12 }
  0x90   : > { %v399_v12 = vsel %vm398_vm7, %v397_v63, %v396_v8  ;;  %v513_v13 = vrot.slane %v498_v3, 7  ;;  %v515_v14 = vrot.slane %v499_v5, 6  ;;  %v517_v15 = vrot.slane %v500_v6, 5  ;;  %v2825_v6 = vld [vmem:[%s2702_s13 + $0x1d] sm:$0x1] }
  0x91   : > { %2087 = vmatmul.mubr.msk.f32.vlgmr.msra.gmra.mrb[0].mxu0 %vm422_vm8, %v399_v12  ;;  %v519_v16 = vrot.slane %v501_v7, 4  ;;  %v521_v18 = vrot.slane %v502_v9, 3  ;;  %v523_v20 = vrot.slane %v503_v10, 2  ;;  %v525_v22 = vrot.slane %v504_v11, 1  ;;  %v2833_v12 = vld [vmem:[%s2702_s13 + $0x12] sm:$0x1]  ;;  %p2331_p13 = pnand %p2330_p6, %p2324_p9 }
  0x92   : > { %v514_v17 = vsel %vm380_vm1, %v513_v13, %v497_v2  ;;  %2101 = vmatprep.mubr.msk.f32.mxu0 %vm2447_vm0, %v3447_v0  ;;  %v599_v32 = vshrl.u32 %v598_v31, 7  ;;  %vm606_vm9 = vcmask 64512   ;;  %v894_v45 = vmul.f32 %v2773_v43, %v2773_v43  ;;  %v2866_v31 = vld [vmem:[%s2702_s13 + $0x1e] sm:$0x1] }
  0x93   : > { %v516_v19 = vsel %vm383_vm2, %v515_v14, %v514_v17  ;;  %v895_v48 = vmul.f32 %v2776_v44, %v2776_v44  ;;  %v893_v49 = vmul.f32 %v2781_v46, %v2781_v46  ;;  %v896_v52 = vmul.f32 %v2784_v47, %v2784_v47 }
  0x94   : > { %v518_v21 = vsel %vm386_vm3, %v517_v15, %v516_v19  ;;  %v2765_v34 = vsub.s32 0, %v599_v32  ;;  %v909_v50 = vrot.slane %v894_v45, 7  ;;  %v897_v57 = vmul.f32 %v2791_v51, %v2791_v51 }
  0x95   : > { %v520_v23 = vsel %vm389_vm4, %v519_v16, %v518_v21  ;;  %v911_v53 = vrot.slane %v895_v48, 6  ;;  %v913_v58 = vrot.slane %v896_v52, 5  ;;  %v1256_v61 = vmul.f32 %v2797_v55, %v2797_v55  ;;  %v2840_v16 = vld [vmem:[%s2702_s13 + $0x7] sm:$0x1] }
  0x96   : > { %v522_v24 = vsel %vm392_vm5, %v521_v18, %v520_v23  ;;  %3481 = vst [vmem:[#allocation19_spill] sm:$0xff] %v2765_v34  ;;  %v910_v54 = vsel %vm380_vm1, %v909_v50, %v893_v49  ;;  %v898_v63 = vmul.f32 %v2800_v56, %v2800_v56  ;;  %v915_v2 = vrot.slane %v897_v57, 4  ;;  %v2850_v23 = vld [vmem:[%s2702_s13 + $0xb] sm:$0x1]  ;;  %v2885_v49 = vld [vmem:[%s2694_s26 + $0x1] sm:$0x1] }
  0x97   : > { %v524_v25 = vsel %vm395_vm6, %v523_v20, %v522_v24  ;;  %v912_v59 = vsel %vm383_vm2, %v911_v53, %v910_v54  ;;  %v1257_v5 = vmul.f32 %v2806_v60, %v2806_v60  ;;  %v899_v7 = vmul.f32 %v2811_v62, %v2811_v62  ;;  %v2845_v20 = vld [vmem:[%s2702_s13 + $0x16] sm:$0x1]  ;;  %3484 = vst [vmem:[#allocation22_spill] sm:$0xff] %v2885_v49  ;;  %v2898_v54 = vld [vmem:[%s2694_s26 + $0x6] sm:$0x1] }
  0x98   : > { %v526_v26 = vsel %vm398_vm7, %v525_v22, %v524_v25  ;;  %v914_v3 = vsel %vm386_vm3, %v913_v58, %v912_v59  ;;  %v1255_v8 = vmul.f32 %v2816_v1, %v2816_v1  ;;  %v1271_v9 = vrot.slane %v1256_v61, 7  ;;  %v2855_v25 = vld [vmem:[%s2694_s26 + $0x5] sm:$0x1]  ;;  %v2903_v61 = vld [vmem:[%s2694_s26 + $0xd] sm:$0x1] }
  0x99   : > { %v528_v27 = vsel %vm422_vm8, %v526_v26, 0.0  ;;  %v917_v10 = vrot.slane %v898_v63, 3  ;;  %v916_v11 = vsel %vm389_vm4, %v915_v2, %v914_v3  ;;  %v1258_v13 = vmul.f32 %v2820_v4, %v2820_v4 }
  0x9a   : > { %529 = vadd.xlane.f32.xlu0 %v528_v27  ;;  %v900_v14 = vmul.f32 %v2825_v6, %v2825_v6  ;;  %v1273_v15 = vrot.slane %v1257_v5, 6  ;;  %v919_v17 = vrot.slane %v899_v7, 2  ;;  %v1272_v18 = vsel %vm380_vm1, %v1271_v9, %v1255_v8  ;;  %v2911_v8 = vld [vmem:[%s2702_s13 + $0x17] sm:$0x1] }
  0x9b   : > { %v918_v19 = vsel %vm392_vm5, %v917_v10, %v916_v11  ;;  %v1259_v21 = vmul.f32 %v2833_v12, %v2833_v12  ;;  %v1275_v22 = vrot.slane %v1258_v13, 5  ;;  %v1618_v24 = vmul.f32 %v2840_v16, %v2840_v16  ;;  %v2915_v10 = vld [vmem:[%s2694_s26 + $0xa] sm:$0x1]  ;;  %v2920_v13 = vld [vmem:[%s2694_s26 + $0x7] sm:$0x1] }
  0x9c   : > { %v921_v26 = vrot.slane %v900_v14, 1  ;;  %v1274_v27 = vsel %vm383_vm2, %v1273_v15, %v1272_v18  ;;  %v1260_v32 = vmul.f32 %v2845_v20, %v2845_v20  ;;  %v2892_v53 = vmul.f32 %v2866_v31, %v2866_v31  ;;  %3485 = vst [vmem:[#allocation23_spill] sm:$0xff] %v2920_v13  ;;  %v2928_v18 = vld [vmem:[%s2694_s26 + $0x11] sm:$0x1] }
  0x9d   : > { %v1633_v48 = vrot.slane %v1618_v24, 7  ;;  %v858_v5 = vmul.f32 %v2885_v49, %v2885_v49  ;;  %v1221_v11 = vmul.f32 %v2898_v54, %v2898_v54  ;;  %v3018_v49 = vld [vmem:[%s2694_s26 + $0x1a] sm:$0x1] }
  0x9e   : > { %v1279_v58 = vrot.slane %v1260_v32, 3  ;;  %v1283_v24 = vrot.slane %v2892_v53, 1  ;;  %v2962_v53 = vld [vmem:[%s2694_s26 + $0x3] sm:$0x1] }
  0x9f   : > { %3488 = vst [vmem:[#allocation26_spill] sm:$0xff] %v2962_v53 }
 0x11a   : > { %v565_v28 = vpop.xlane.xlu0 %564 }
 0x11b   : > { %566 = vxpose.xlu1.b32.start.end [1/1] (short) (narrow) %v565_v28, 8  ;;  %v2859_v28 = vld [vmem:[%s2702_s13 + $0x3] sm:$0x1] }
 0x11c   : > { %3483 = vst [vmem:[#allocation21_spill] sm:$0xff] %v2859_v28  ;;  %v1617_v45 = vmul.f32 %v2859_v28, %v2859_v28 }
 0x11e   : > { %v1634_v9 = vsel %vm380_vm1, %v1633_v48, %v1617_v45  ;;  %v2955_v45 = vld [vmem:[%s2694_s26 + $0x15] sm:$0x1]  ;;  %v862_v48 = vmul.f32 %v2928_v18, %v2928_v18 }
 0x120   : > { %v880_v0 = vrot.slane %v862_v48, 4 }
 0x127   : > { %v530_v33 = vpop.xlane.xlu0 %529 }
 0x128   : > { %v531_v35 = vmul.f32 32.0, %v530_v33 }
 0x164   : > { %v493_v29 = vpop.f32.mrb[0].mxu0 }
 0x165   : > { %v2088_v30 = vpop.f32.mrb[1].mxu0 }
 0x166   : > { %v2863_v30 = vld [vmem:[%s2702_s13 + $0x1a] sm:$0x1] }
 0x167   : > { %v1261_v52 = vmul.f32 %v2863_v30, %v2863_v30 }
 0x169   : > { %v1281_v15 = vrot.slane %v1261_v52, 2  ;;  %v1236_v52 = vrot.slane %v1221_v11, 7  ;;  %v2978_v11 = vld [vmem:[%s2694_s26 + $0xf] sm:$0x1] }
 0x16a   : > { %3489 = vst [vmem:[#allocation27_spill] sm:$0xff] %v2978_v11 }
 0x19b   : > { %v582_v36 = vpop.trf.xlu1 }
 0x19c   : > { %v601_v37 = vrot.slane %v582_v36, %v2765_v34  ;;  %v2871_v36 = vld [vmem:[%s2702_s13 + $0xf] sm:$0x1] }
 0x19d   : > { %v1620_v59 = vmul.f32 %v2871_v36, %v2871_v36 }
 0x19e   : > { %v602_v38 = vmul.f32 %v601_v37, %v531_v35  ;;  %v1277_v35 = vrot.slane %v1259_v21, 4  ;;  %v1619_v37 = vmul.f32 %v2850_v23, %v2850_v23  ;;  %v2933_v21 = vld [vmem:[%s2694_s26 + $0x2] sm:$0x1] }
 0x19f   : > { %3486 = vst [vmem:[#allocation24_spill] sm:$0xff] %v2933_v21 }
 0x1a0   : > { %v603_v39 = vmax.f32 %v602_v38, 3.2e-15  ;;  %v2876_v38 = vld [vmem:[%s2694_s26 + $0x9] sm:$0x1]  ;;  %v1635_v3 = vrot.slane %v1619_v37, 6  ;;  %v1222_v37 = vmul.f32 %v2915_v10, %v2915_v10 }
 0x1a1   : > { %v860_v63 = vmul.f32 %v2876_v38, %v2876_v38 }
 0x1a2   : > { %2207 = vrsqrt.f32 %v603_v39  ;;  %v859_v39 = vmul.f32 %v2855_v25, %v2855_v25  ;;  %v1636_v32 = vsel %vm383_vm2, %v1635_v3, %v1634_v9 }
 0x1a4   : > { %v874_v7 = vrot.slane %v859_v39, 7  ;;  %v2948_v39 = vld [vmem:[%s2694_s26 + $0xb] sm:$0x1] }
 0x1a5   : > { %3487 = vst [vmem:[#allocation25_spill] sm:$0xff] %v2948_v39 }
 0x1ac   : > { %v2208_v40 = vpop.eup %2207 }
 0x1ad   : > { %v2768_v41 = vmul.f32 %v2208_v40, %v493_v29  ;;  %v920_v29 = vsel %vm395_vm6, %v919_v17, %v918_v19  ;;  %v861_v19 = vmul.f32 %v2903_v61, %v2903_v61 }
 0x1ae   : > { %v922_v50 = vsel %vm398_vm7, %v921_v26, %v920_v29  ;;  %v2938_v26 = vld [vmem:[%s2702_s13 + $0x1b] sm:$0x1]  ;;  %v876_v29 = vrot.slane %v860_v63, 6 }
 0x1af   : > { %v607_v42 = vsel %vm606_vm9, %v2768_v41, -inf  ;;  %v2923_v14 = vsel %vm422_vm8, %v922_v50, 0.0  ;;  %v1220_v50 = vmul.f32 %v2933_v21, %v2933_v21 }
 0x1b0   : > { %608 = vmax.xlane.f32.xlu1 %v607_v42  ;;  %v1276_v42 = vsel %vm386_vm3, %v1275_v22, %v1274_v27  ;;  %v1637_v27 = vrot.slane %v1620_v59, 5  ;;  %v1623_v59 = vmul.f32 %v2938_v26, %v2938_v26 }
 0x1b1   : > { %v1278_v2 = vsel %vm389_vm4, %v1277_v35, %v1276_v42  ;;  %v2943_v35 = vld [vmem:[%s2694_s26 + $0xe] sm:$0x1]  ;;  %v1622_v42 = vmul.f32 %v2911_v8, %v2911_v8  ;;  %v1237_v34 = vsel %vm380_vm1, %v1236_v52, %v1220_v50  ;;  %v3007_v50 = vld [vmem:[%s2694_s26 + $0x1d] sm:$0x1] }
 0x1b2   : > { %v1280_v22 = vsel %vm392_vm5, %v1279_v58, %v1278_v2  ;;  %v2966_v58 = vld [vmem:[%s2702_s13 + $0x1f] sm:$0x1]  ;;  %v878_v2 = vrot.slane %v861_v19, 5  ;;  %v1638_v3 = vsel %vm386_vm3, %v1637_v27, %v1636_v32  ;;  %v1223_v9 = vmul.f32 %v2943_v35, %v2943_v35 }
 0x1b3   : > { %v1238_v19 = vrot.slane %v1222_v37, 6  ;;  %v1582_v27 = vmul.f32 %v2962_v53, %v2962_v53  ;;  %v1624_v32 = vmul.f32 %v2966_v58, %v2966_v58  ;;  %v1643_v48 = vrot.slane %v1623_v59, 2 }
 0x1b5   : > { %v1239_v53 = vsel %vm383_vm2, %v1238_v19, %v1237_v34  ;;  %v865_v19 = vmul.f32 %v3007_v50, %v3007_v50 }
 0x23d   : > { %v609_v33 = vpop.xlane.xlu1 %608 }
 0x23e   : > { %v610_v40 = vsub.f32 %v2768_v41, %v609_v33  ;;  %v2895_v41 = vld [vmem:[%s2702_s13 + $0x13] sm:$0x1]  ;;  %v875_v33 = vsel %vm380_vm1, %v874_v7, %v858_v5  ;;  %v2973_v7 = vld [vmem:[%s2694_s26 + $0x12] sm:$0x1] }
 0x23f   : > { %v1621_v17 = vmul.f32 %v2895_v41, %v2895_v41  ;;  %v877_v5 = vsel %vm383_vm2, %v876_v29, %v875_v33  ;;  %v1641_v33 = vrot.slane %v1622_v42, 3  ;;  %v1224_v37 = vmul.f32 %v2973_v7, %v2973_v7 }
 0x240   : > { %v611_v57 = vmul.f32 1.442695, %v610_v40  ;;  %v1583_v40 = vmul.f32 %v2920_v13, %v2920_v13  ;;  %v879_v21 = vsel %vm386_vm3, %v878_v2, %v877_v5  ;;  %v3000_v13 = vld [vmem:[%s2694_s26 + $0x13] sm:$0x1] }
 0x241   : > { %v1639_v63 = vrot.slane %v1621_v17, 4  ;;  %v863_v17 = vmul.f32 %v2955_v45, %v2955_v45  ;;  %v881_v59 = vsel %vm389_vm4, %v880_v0, %v879_v21 }
 0x242   : > { %2209 = vpow2.f32 %v611_v57  ;;  %v1282_v57 = vsel %vm395_vm6, %v1281_v15, %v1280_v22  ;;  %v1584_v15 = vmul.f32 %v2948_v39, %v2948_v39  ;;  %v2983_v22 = vld [vmem:[%s2694_s26 + $0x19] sm:$0x1]  ;;  %v1598_v29 = vrot.slane %v1583_v40, 7  ;;  %v2995_v39 = vld [vmem:[%s2694_s26 + $0x16] sm:$0x1] }
 0x243   : > { %v1640_v28 = vsel %vm389_vm4, %v1639_v63, %v1638_v3  ;;  %3490 = vst [vmem:[#allocation28_spill] sm:$0xff] %v2995_v39  ;;  %v1585_v40 = vmul.f32 %v2978_v11, %v2978_v11  ;;  %v864_v52 = vmul.f32 %v2983_v22, %v2983_v22  ;;  %v1240_v63 = vrot.slane %v1223_v9, 5 }
 0x244   : > { %v1600_v2 = vrot.slane %v1584_v15, 6  ;;  %v882_v5 = vrot.slane %v863_v17, 3  ;;  %v1599_v1 = vsel %vm380_vm1, %v1598_v29, %v1582_v27  ;;  %v1642_v11 = vsel %vm392_vm5, %v1641_v33, %v1640_v28  ;;  %v3023_v15 = vld [vmem:[%s2694_s26 + $0x17] sm:$0x1] }
 0x245   : > { %v1225_v9 = vmul.f32 %v2995_v39, %v2995_v39  ;;  %v1586_v17 = vmul.f32 %v3000_v13, %v3000_v13  ;;  %v1284_v34 = vsel %vm398_vm7, %v1283_v24, %v1282_v57  ;;  %v1242_v28 = vrot.slane %v1224_v37, 4  ;;  %v3035_v39 = vld [vmem:[%s2694_s26 + $0x1e] sm:$0x1]  ;;  %v3040_v57 = vld [vmem:[%s2694_s26 + $0x1b] sm:$0x1] }
 0x246   : > { %v1602_v27 = vrot.slane %v1585_v40, 5  ;;  %v1645_v29 = vrot.slane %v1624_v32, 1  ;;  %v884_v0 = vrot.slane %v864_v52, 2  ;;  %v1241_v21 = vsel %vm386_vm3, %v1240_v63, %v1239_v53  ;;  %v3055_v37 = vld [vmem:[%s2694_s26 + $0x1f] sm:$0x1] }
 0x247   : > { %v1601_v33 = vsel %vm383_vm2, %v1600_v2, %v1599_v1  ;;  %v1226_v24 = vmul.f32 %v3018_v49, %v3018_v49  ;;  %v1587_v32 = vmul.f32 %v3023_v15, %v3023_v15  ;;  %v772_v53 = vrot.slane %v2776_v44, 6 }
 0x248   : > { %v1244_v1 = vrot.slane %v1225_v9, 3  ;;  %v1286_v40 = vsel %vm422_vm8, %v1284_v34, 0.0  ;;  %v1243_v52 = vsel %vm389_vm4, %v1242_v28, %v1241_v21  ;;  %v1603_v63 = vsel %vm386_vm3, %v1602_v27, %v1601_v33 }
 0x249   : > { %v1246_v34 = vrot.slane %v1226_v24, 2  ;;  %v369_v24 = vld [vmem:[%s3077_s21 + $0x18] sm:$0x1]  ;;  %v3496_v44 = vrot.slane %v2791_v51, 4 }
 0x24c   : > { %v3004_v42 = vpop.eup %2209 }
 0x24d   : > { %3491 = vst [vmem:[#allocation29_spill] sm:$0xff] %v3004_v42  ;;  %v613_v3 = vsel %vm606_vm9, %v3004_v42, 0.0  ;;  %v883_v42 = vsel %vm392_vm5, %v882_v5, %v881_v59  ;;  %v1227_v59 = vmul.f32 %v3035_v39, %v3035_v39 }
 0x24e   : > { %614 = vadd.xlane.f32.xlu0 %v613_v3  ;;  %v1644_v3 = vsel %vm395_vm6, %v1643_v48, %v1642_v11  ;;  %v1604_v11 = vrot.slane %v1586_v17, 4  ;;  %v886_v48 = vrot.slane %v865_v19, 1  ;;  %v885_v5 = vsel %vm395_vm6, %v884_v0, %v883_v42  ;;  %v367_v0 = vld [vmem:[%s3077_s21 + $0x10] sm:$0x1]  ;;  %v370_v17 = vld [vmem:[%s3077_s21 + $0x1c] sm:$0x1] }
 0x24f   : > { %v1646_v2 = vsel %vm398_vm7, %v1645_v29, %v1644_v3  ;;  %v1606_v19 = vrot.slane %v1587_v32, 3  ;;  %v1245_v42 = vsel %vm392_vm5, %v1244_v1, %v1243_v52  ;;  %v1589_v3 = vmul.f32 %v3055_v37, %v3055_v37  ;;  %v368_v32 = vld [vmem:[%s3077_s21 + $0x14] sm:$0x1] }
 0x250   : > { %v1605_v29 = vsel %vm389_vm4, %v1604_v11, %v1603_v63  ;;  %v1648_v21 = vsel %vm422_vm8, %v1646_v2, 0.0  ;;  %v887_v33 = vsel %vm398_vm7, %v886_v48, %v885_v5  ;;  %v1248_v27 = vrot.slane %v1227_v59, 1  ;;  %v364_v48 = vld [vmem:[%s3077_s21 + $0x4] sm:$0x1]  ;;  %v365_v59 = vld [vmem:[%s3077_s21 + $0x8] sm:$0x1] }
 0x251   : > { %v1247_v11 = vsel %vm395_vm6, %v1246_v34, %v1245_v42  ;;  %v1607_v52 = vsel %vm392_vm5, %v1606_v19, %v1605_v29  ;;  %v889_v5 = vsel %vm422_vm8, %v887_v33, 0.0  ;;  %v1610_v34 = vrot.slane %v1589_v3, 1  ;;  %v363_v19 = vld [vmem:[%s3077_s21] sm:$0x1]  ;;  %v366_v42 = vld [vmem:[%s3077_s21 + $0xc] sm:$0x1] }
 0x252   : > { %925 = vadd.xlane.f32.xlu0 %v2923_v14  ;;  %v1588_v14 = vmul.f32 %v3040_v57, %v3040_v57  ;;  %v628_v29 = vrot.slane %v365_v59, 6  ;;  %v1249_v1 = vsel %vm398_vm7, %v1248_v27, %v1247_v11  ;;  %v630_v2 = vrot.slane %v366_v42, 5 }
 0x253   : > { %v632_v33 = vrot.slane %v367_v0, 4  ;;  %v634_v9 = vrot.slane %v368_v32, 3  ;;  %v1144_v3 = vrot.slane %v2866_v31, 1  ;;  %v1496_v59 = vrot.slane %v2850_v23, 6 }
 0x254   : > { %v1608_v28 = vrot.slane %v1588_v14, 2  ;;  %v626_v14 = vrot.slane %v364_v48, 7  ;;  %v1494_v48 = vrot.slane %v2840_v16, 7  ;;  %v636_v27 = vrot.slane %v369_v24, 2 }
 0x255   : > { %v1251_v11 = vsel %vm422_vm8, %v1249_v1, 0.0  ;;  %v1502_v0 = vrot.slane %v2911_v8, 3  ;;  %v1504_v16 = vrot.slane %v2938_v26, 2  ;;  %v748_v24 = vrot.slane %v2855_v25, 7 }
 0x256   : > { %1287 = vadd.xlane.f32.xlu0 %v1286_v40  ;;  %v1609_v40 = vsel %vm395_vm6, %v1608_v28, %v1607_v52  ;;  %v627_v63 = vsel %vm380_vm1, %v626_v14, %v363_v19  ;;  %v1498_v28 = vrot.slane %v2871_v36, 5  ;;  %v638_v14 = vrot.slane %v370_v17, 1 }
 0x257   : > { %v1611_v32 = vsel %vm398_vm7, %v1610_v34, %v1609_v40  ;;  %v750_v1 = vrot.slane %v2876_v38, 6  ;;  %v752_v17 = vrot.slane %v2903_v61, 5  ;;  %v756_v40 = vrot.slane %v2955_v45, 3 }
 0x258   : > { %v1613_v34 = vsel %vm422_vm8, %v1611_v32, 0.0  ;;  %v3492_v25 = vrot.slane %v2773_v43, 7  ;;  %v758_v38 = vrot.slane %v2983_v22, 2  ;;  %v760_v61 = vrot.slane %v3007_v50, 1  ;;  %v3495_v50 = vld [vmem:[#allocation28_spill] sm:$0xff] }
 0x259   : > { %v3493_v43 = vmov 0.0   ;;  %v1482_v31 = vrot.slane %v3040_v57, 2 }
 0x25a   : > { %1649 = vadd.xlane.f32.xlu0 %v1648_v21  ;;  %v629_v21 = vsel %vm383_vm2, %v628_v29, %v627_v63  ;;  %v1500_v63 = vrot.slane %v2895_v41, 4 }
 0x25b   : > { %v631_v52 = vsel %vm386_vm3, %v630_v2, %v629_v21  ;;  %v754_v2 = vrot.slane %v2928_v18, 4  ;;  %v1110_v18 = vrot.slane %v2898_v54, 7  ;;  %v1120_v54 = vrot.slane %v3018_v49, 2 }
 0x25c   : > { %v633_v19 = vsel %vm389_vm4, %v632_v33, %v631_v52  ;;  %v1112_v33 = vrot.slane %v2915_v10, 6  ;;  %v1118_v52 = vrot.slane %v3495_v50, 3  ;;  %v3497_v10 = vld [vmem:[#allocation22_spill] sm:$0xff] }
 0x25d   : > { %v635_v42 = vsel %vm392_vm5, %v634_v9, %v633_v19  ;;  %v771_v9 = vsel %vm380_vm1, %v3492_v25, %v2781_v46  ;;  %v3494_v46 = vrot.slane %v2784_v47, 5  ;;  %v3499_v19 = vld [vmem:[#allocation20_spill] sm:$0xff]  ;;  %v3504_v25 = vld [vmem:[#allocation25_spill] sm:$0xff] }
 0x25e   : > { %890 = vadd.xlane.f32.xlu0 %v889_v5  ;;  %v1506_v5 = vrot.slane %v2966_v58, 1  ;;  %v637_v29 = vsel %vm395_vm6, %v636_v27, %v635_v42  ;;  %v773_v45 = vsel %vm383_vm2, %v772_v53, %v771_v9  ;;  %v1114_v27 = vrot.slane %v2943_v35, 5 }
 0x25f   : > { %v639_v21 = vsel %vm398_vm7, %v638_v14, %v637_v29  ;;  %v775_v22 = vsel %vm386_vm3, %v3494_v46, %v773_v45  ;;  %v749_v35 = vsel %vm380_vm1, %v748_v24, %v3497_v10  ;;  %v3498_v14 = vrot.slane %v2800_v56, 3  ;;  %v3501_v29 = vld [vmem:[#allocation23_spill] sm:$0xff] }
 0x260   : > { %2090 = vmatpush3.msra.mxu1 %v639_v21  ;;  %v777_v53 = vsel %vm389_vm4, %v3496_v44, %v775_v22  ;;  %v751_v32 = vsel %vm383_vm2, %v750_v1, %v749_v35  ;;  %v3500_v42 = vrot.slane %v2797_v55, 7  ;;  %v1472_v51 = vrot.slane %v3501_v29, 7  ;;  %v3507_v22 = vld [vmem:[#allocation27_spill] sm:$0xff] }
 0x261   : > { %2094 = vmatprep.subr.mxu1 %v3493_v43  ;;  %v779_v47 = vsel %vm392_vm5, %v3498_v14, %v777_v53  ;;  %v753_v24 = vsel %vm386_vm3, %v752_v17, %v751_v32  ;;  %v1474_v9 = vrot.slane %v3504_v25, 6  ;;  %v3505_v1 = vrot.slane %v2825_v6, 1  ;;  %v3509_v53 = vld [vmem:[#allocation24_spill] sm:$0xff]  ;;  %v3511_v14 = vld [vmem:[#allocation21_spill] sm:$0xff] }
 0x262   : > { %1252 = vadd.xlane.f32.xlu0 %v1251_v11  ;;  %v1116_v11 = vrot.slane %v2973_v7, 4  ;;  %v1122_v7 = vrot.slane %v3035_v39, 1  ;;  %v1133_v49 = vsel %vm380_vm1, %v3500_v42, %v3499_v19  ;;  %v3503_v39 = vrot.slane %v2806_v60, 6 }
 0x263   : > { %v755_v45 = vsel %vm389_vm4, %v754_v2, %v753_v24  ;;  %v3506_v46 = vrot.slane %v2820_v4, 5  ;;  %v1476_v50 = vrot.slane %v3507_v22, 5  ;;  %v3508_v60 = vrot.slane %v2833_v12, 4 }
 0x264   : > { %v1135_v56 = vsel %vm383_vm2, %v3503_v39, %v1133_v49  ;;  %v757_v17 = vsel %vm392_vm5, %v756_v40, %v755_v45  ;;  %v1111_v10 = vsel %vm380_vm1, %v1110_v18, %v3509_v53  ;;  %v3510_v35 = vrot.slane %v2845_v20, 3 }
 0x265   : > { %v759_v6 = vsel %vm395_vm6, %v758_v38, %v757_v17  ;;  %v1113_v4 = vsel %vm383_vm2, %v1112_v33, %v1111_v10  ;;  %v3512_v12 = vrot.slane %v2863_v30, 2  ;;  %v1478_v20 = vrot.slane %v3000_v13, 4 }
 0x266   : > { %1614 = vadd.xlane.f32.xlu0 %v1613_v34  ;;  %v3502_v34 = vrot.slane %v2811_v62, 2  ;;  %v1137_v62 = vsel %vm386_vm3, %v3506_v46, %v1135_v56  ;;  %v761_v40 = vsel %vm398_vm7, %v760_v61, %v759_v6  ;;  %v1115_v19 = vsel %vm386_vm3, %v1114_v27, %v1113_v4 }
 0x267   : > { %v1139_v44 = vsel %vm389_vm4, %v3508_v60, %v1137_v62  ;;  %v1480_v61 = vrot.slane %v3023_v15, 3  ;;  %v1484_v15 = vrot.slane %v3055_v37, 1 }
 0x268   : > { %v781_v21 = vsel %vm395_vm6, %v3502_v34, %v779_v47  ;;  %v1141_v2 = vsel %vm392_vm5, %v3510_v35, %v1139_v44  ;;  %v1495_v47 = vsel %vm380_vm1, %v1494_v48, %v3511_v14  ;;  %v1117_v48 = vsel %vm389_vm4, %v1116_v11, %v1115_v19 }
 0x269   : > { %v783_v55 = vsel %vm398_vm7, %v3505_v1, %v781_v21  ;;  %v1143_v32 = vsel %vm395_vm6, %v3512_v12, %v1141_v2  ;;  %v1497_v38 = vsel %vm383_vm2, %v1496_v59, %v1495_v47  ;;  %v1119_v33 = vsel %vm392_vm5, %v1118_v52, %v1117_v48  ;;  %v3513_v59 = vld [vmem:[#allocation26_spill] sm:$0xff]  ;;  %v3515_v21 = vld [vmem:[#allocation19_spill] sm:$0xff] }
 0x26a   : > { %v1145_v18 = vsel %vm398_vm7, %v1144_v3, %v1143_v32  ;;  %v1499_v30 = vsel %vm386_vm3, %v1498_v28, %v1497_v38  ;;  %v1473_v13 = vsel %vm380_vm1, %v1472_v51, %v3513_v59  ;;  %v1121_v3 = vsel %vm395_vm6, %v1120_v54, %v1119_v33 }
 0x26b   : > { %v1501_v23 = vsel %vm389_vm4, %v1500_v63, %v1499_v30  ;;  %v1475_v28 = vsel %vm383_vm2, %v1474_v9, %v1473_v13  ;;  %v1123_v27 = vsel %vm398_vm7, %v1122_v7, %v1121_v3  ;;  %v3514_v7 = vld [vmem:[#allocation29_spill] sm:$0xff] }
 0x26c   : > { %v1503_v36 = vsel %vm392_vm5, %v1502_v0, %v1501_v23  ;;  %v1477_v63 = vsel %vm386_vm3, %v1476_v50, %v1475_v28 }
 0x26d   : > { %v1505_v41 = vsel %vm395_vm6, %v1504_v16, %v1503_v36  ;;  %v1479_v8 = vsel %vm389_vm4, %v1478_v20, %v1477_v63 }
 0x26e   : > { %v1507_v57 = vsel %vm398_vm7, %v1506_v5, %v1505_v41  ;;  %v1481_v0 = vsel %vm392_vm5, %v1480_v61, %v1479_v8  ;;  %v734_v8 = vld [vmem:[%s3077_s21 + $0x9] sm:$0x1] }
 0x26f   : > { %v1483_v11 = vsel %vm395_vm6, %v1482_v31, %v1481_v0 }
 0x270   : > { %v1485_v37 = vsel %vm398_vm7, %v1484_v15, %v1483_v11  ;;  %v732_v11 = vld [vmem:[%s3077_s21 + $0x1] sm:$0x1] }
 0x2db   : > { %v615_v52 = vpop.xlane.xlu0 %614 }
 0x2dc   : > { %2211 = vrcp.f32 %v615_v52  ;;  %v988_v52 = vrot.slane %v734_v8, 6 }
 0x2df   : > { %v926_v26 = vpop.xlane.xlu0 %925 }
 0x2e0   : > { %927 = vxpose.xlu0.b32.start.end [1/1] (short) (narrow) %v926_v26, 8  ;;  %v736_v26 = vld [vmem:[%s3077_s21 + $0x11] sm:$0x1] }
 0x2e3   : > { %v1288_v16 = vpop.xlane.xlu0 %1287 }
 0x2e4   : > { %1289 = vxpose.xlu1.b32.start.end [1/1] (short) (narrow) %v1288_v16, 8 }
 0x2e6   : > { %v2212_v54 = vpop.eup %2211 }
 0x2e7   : > { %v617_v58 = vmul.f32 %v2212_v54, %v3514_v7  ;;  %v1650_v42 = vpop.xlane.xlu0 %1649  ;;  %v737_v7 = vld [vmem:[%s3077_s21 + $0x15] sm:$0x1] }
 0x2e8   : > { %1651 = vxpose.xlu0.b32.start.end [1/1] (short) (narrow) %v1650_v42, 8  ;;  %v992_v42 = vrot.slane %v736_v26, 4 }
 0x2e9   : > { %2092 = vmatmul.mubr.msk.f32.vlgmr.msra.gmra.mrb[0].mxu1 %vm606_vm9, %v617_v58  ;;  %715 = vst.msk [vmem:[%s3223_s27] sm:$0xff] %vm606_vm9, %v617_v58 }
 0x2ea   : > { %2095 = vmatpush3.xpose.msk.msra.mxu1 %vm422_vm8, %v783_v55  ;;  %2096 = vmatprep.mubr.msk.f32.mxu1 %vm2447_vm0, %v3493_v43 }
 0x2eb   : > { %2104 = vmatprep.subr.mxu1 %v3493_v43  ;;  %v891_v5 = vpop.xlane.xlu0 %890 }
 0x2ec   : > { %v892_v34 = vmul.f32 32.0, %v891_v5  ;;  %v738_v5 = vld [vmem:[%s3077_s21 + $0x19] sm:$0x1] }
 0x2ed   : > { %2097 = vmatmul.mubr.msk.f32.vlgmr.msra.gmra.mrb[2].mxu1 %vm422_vm8, %v761_v40 }
 0x2ee   : > { %2105 = vmatpush3.xpose.msk.msra.mxu1 %vm422_vm8, %v1145_v18  ;;  %2106 = vmatprep.mubr.msk.f32.mxu1 %vm2447_vm0, %v3493_v43 }
 0x2ef   : > { %2114 = vmatprep.subr.mxu1 %v3493_v43  ;;  %v1253_v49 = vpop.xlane.xlu0 %1252 }
 0x2f0   : > { %v1254_v56 = vmul.f32 32.0, %v1253_v49 }
 0x2f1   : > { %2107 = vmatmul.mubr.msk.f32.vlgmr.msra.gmra.mrb[4].mxu1 %vm422_vm8, %v1123_v27 }
 0x2f2   : > { %2115 = vmatpush3.xpose.msk.msra.mxu1 %vm422_vm8, %v1507_v57  ;;  %2116 = vmatprep.mubr.msk.f32.mxu1 %vm2447_vm0, %v3493_v43  ;;  %v733_v57 = vld [vmem:[%s3077_s21 + $0x5] sm:$0x1] }
 0x2f3   : > { %v1615_v29 = vpop.xlane.xlu0 %1614  ;;  %v986_v0 = vrot.slane %v733_v57, 7 }
 0x2f4   : > { %v1616_v55 = vmul.f32 32.0, %v1615_v29  ;;  %v994_v29 = vrot.slane %v737_v7, 3 }
 0x2f5   : > { %2117 = vmatmul.mubr.msk.f32.vlgmr.msra.gmra.mrb[6].mxu1 %vm422_vm8, %v1485_v37  ;;  %v735_v37 = vld [vmem:[%s3077_s21 + $0xd] sm:$0x1]  ;;  %v987_v16 = vsel %vm380_vm1, %v986_v0, %v732_v11  ;;  %v1463_v0 = vld [vmem:[%s3077_s21 + $0x1f] sm:$0x1] }
 0x2f6   : > { %v990_v54 = vrot.slane %v735_v37, 5  ;;  %v989_v58 = vsel %vm383_vm2, %v988_v52, %v987_v16 }
 0x2f8   : > { %v991_v49 = vsel %vm386_vm3, %v990_v54, %v989_v58  ;;  %v1722_v54 = vrot.slane %v1463_v0, 1 }
 0x360   : > { %v943_v51 = vpop.trf.xlu0 }
 0x361   : > { %v962_v24 = vrot.slane %v943_v51, %v3515_v21  ;;  %v739_v51 = vld [vmem:[%s3077_s21 + $0x1d] sm:$0x1] }
 0x363   : > { %v963_v25 = vmul.f32 %v962_v24, %v892_v34  ;;  %v993_v34 = vsel %vm389_vm4, %v992_v42, %v991_v49 }
 0x364   : > { %v1305_v39 = vpop.trf.xlu1  ;;  %v995_v24 = vsel %vm392_vm5, %v994_v29, %v993_v34 }
 0x365   : > { %v1324_v9 = vrot.slane %v1305_v39, %v3515_v21  ;;  %v964_v45 = vmax.f32 %v963_v25, 3.2e-15  ;;  %v998_v39 = vrot.slane %v739_v51, 1 }
 0x367   : > { %v1325_v46 = vmul.f32 %v1324_v9, %v1254_v56  ;;  %2213 = vrsqrt.f32 %v964_v45  ;;  %v1095_v9 = vld [vmem:[%s3077_s21 + $0x6] sm:$0x1]  ;;  %v1094_v45 = vld [vmem:[%s3077_s21 + $0x2] sm:$0x1] }
 0x368   : > { %v1667_v1 = vpop.trf.xlu0 }
 0x369   : > { %v1686_v62 = vrot.slane %v1667_v1, %v3515_v21  ;;  %v1326_v22 = vmax.f32 %v1325_v46, 3.2e-15  ;;  %v996_v21 = vrot.slane %v738_v5, 2  ;;  %v1096_v1 = vld [vmem:[%s3077_s21 + $0xa] sm:$0x1] }
 0x36a   : > { %v1457_v46 = vld [vmem:[%s3077_s21 + $0x7] sm:$0x1] }
 0x36b   : > { %v1687_v50 = vmul.f32 %v1686_v62, %v1616_v55  ;;  %2215 = vrsqrt.f32 %v1326_v22  ;;  %v997_v56 = vsel %vm395_vm6, %v996_v21, %v995_v24  ;;  %v1348_v55 = vrot.slane %v1095_v9, 7  ;;  %v1097_v62 = vld [vmem:[%s3077_s21 + $0xe] sm:$0x1] }
 0x36c   : > { %v999_v25 = vsel %vm398_vm7, %v998_v39, %v997_v56  ;;  %v1350_v22 = vrot.slane %v1096_v1, 6 }
 0x36d   : > { %v1688_v17 = vmax.f32 %v1687_v50, 3.2e-15  ;;  %2100 = vmatpush3.msra.mxu0 %v999_v25  ;;  %v1349_v50 = vsel %vm380_vm1, %v1348_v55, %v1094_v45 }
 0x36e   : > { %2109 = vmatprep.subr.mxu0 %v3493_v43 }
 0x36f   : > { %2217 = vrsqrt.f32 %v1688_v17  ;;  %v1458_v17 = vld [vmem:[%s3077_s21 + $0xb] sm:$0x1] }
 0x371   : > { %v2214_v53 = vpop.eup %2213 }
 0x375   : > { %v2216_v4 = vpop.eup %2215 }
 0x379   : > { %v2218_v32 = vpop.eup %2217 }
 0x3bc   : > { %v710_v60 = vpop.f32.mrb[0].mxu1 }
 0x3bd   : > { %714 = vst.msk [vmem:[%s3245_s19] sm:$0xff] %vm422_vm8, %v710_v60  ;;  %v2093_v44 = vpop.f32.mrb[1].mxu1  ;;  %v1710_v60 = vrot.slane %v1457_v46, 7 }
 0x3be   : > { %v1456_v44 = vld [vmem:[%s3077_s21 + $0x3] sm:$0x1] }
 0x3c0   : > { %v854_v10 = vpop.f32.mrb[2].mxu1 }
 0x3c1   : > { %v966_v6 = vmul.f32 %v2214_v53, %v854_v10  ;;  %v2098_v35 = vpop.f32.mrb[3].mxu1  ;;  %v1098_v53 = vld [vmem:[%s3077_s21 + $0x12] sm:$0x1]  ;;  %v1352_v10 = vrot.slane %v1097_v62, 5 }
 0x3c2   : > { %v1459_v35 = vld [vmem:[%s3077_s21 + $0xf] sm:$0x1] }
 0x3c3   : > { %v967_v2 = vsel %vm606_vm9, %v966_v6, -inf }
 0x3c4   : > { %v1216_v14 = vpop.f32.mrb[4].mxu1  ;;  %968 = vmax.xlane.f32.xlu0 %v967_v2  ;;  %v1712_v2 = vrot.slane %v1458_v17, 6 }
 0x3c5   : > { %v1328_v47 = vmul.f32 %v2216_v4, %v1216_v14  ;;  %v2108_v40 = vpop.f32.mrb[5].mxu1  ;;  %v1711_v4 = vsel %vm380_vm1, %v1710_v60, %v1456_v44  ;;  %v1099_v14 = vld [vmem:[%s3077_s21 + $0x16] sm:$0x1] }
 0x3c7   : > { %v1329_v12 = vsel %vm606_vm9, %v1328_v47, -inf }
 0x3c8   : > { %v1578_v19 = vpop.f32.mrb[6].mxu1  ;;  %1330 = vmax.xlane.f32.xlu1 %v1329_v12 }
 0x3c9   : > { %v1690_v38 = vmul.f32 %v2218_v32, %v1578_v19  ;;  %v2118_v20 = vpop.f32.mrb[7].mxu1  ;;  %v1460_v32 = vld [vmem:[%s3077_s21 + $0x13] sm:$0x1]  ;;  %v1714_v19 = vrot.slane %v1459_v35, 5 }
 0x3ca   : > { %v1100_v20 = vld [vmem:[%s3077_s21 + $0x1a] sm:$0x1] }
 0x3cb   : > { %v1691_v18 = vsel %vm606_vm9, %v1690_v38, -inf }
 0x3cc   : > { %1692 = vmax.xlane.f32.xlu0 %v1691_v18  ;;  %v1356_v18 = vrot.slane %v1099_v14, 3 }
 0x451   : > { %v969_v48 = vpop.xlane.xlu0 %968 }
 0x452   : > { %v970_v30 = vsub.f32 %v966_v6, %v969_v48  ;;  %v1351_v6 = vsel %vm383_vm2, %v1350_v22, %v1349_v50 }
 0x453   : > { %v1353_v12 = vsel %vm386_vm3, %v1352_v10, %v1351_v6 }
 0x454   : > { %v971_v61 = vmul.f32 1.442695, %v970_v30  ;;  %v1461_v30 = vld [vmem:[%s3077_s21 + $0x17] sm:$0x1] }
 0x455   : > { %v1331_v33 = vpop.xlane.xlu1 %1330 }
 0x456   : > { %2219 = vpow2.f32 %v971_v61  ;;  %v1332_v23 = vsub.f32 %v1328_v47, %v1331_v33  ;;  %v1354_v47 = vrot.slane %v1098_v53, 4  ;;  %v1716_v61 = vrot.slane %v1460_v32, 4 }
 0x458   : > { %v1333_v59 = vmul.f32 1.442695, %v1332_v23  ;;  %v1355_v48 = vsel %vm389_vm4, %v1354_v47, %v1353_v12 }
 0x459   : > { %v1693_v13 = vpop.xlane.xlu0 %1692 }
 0x45a   : > { %2221 = vpow2.f32 %v1333_v59  ;;  %v1694_v31 = vsub.f32 %v1690_v38, %v1693_v13  ;;  %v1713_v38 = vsel %vm383_vm2, %v1712_v2, %v1711_v4  ;;  %v1101_v59 = vld [vmem:[%s3077_s21 + $0x1e] sm:$0x1]  ;;  %v1358_v13 = vrot.slane %v1100_v20, 2 }
 0x45b   : > { %v1715_v23 = vsel %vm386_vm3, %v1714_v19, %v1713_v38  ;;  %v1360_v57 = vrot.slane %v1101_v59, 1 }
 0x45c   : > { %v1695_v3 = vmul.f32 1.442695, %v1694_v31  ;;  %v1357_v31 = vsel %vm392_vm5, %v1356_v18, %v1355_v48 }
 0x45d   : > { %v1359_v8 = vsel %vm395_vm6, %v1358_v13, %v1357_v31 }
 0x45e   : > { %2223 = vpow2.f32 %v1695_v3  ;;  %v1462_v3 = vld [vmem:[%s3077_s21 + $0x1b] sm:$0x1]  ;;  %v1361_v16 = vsel %vm398_vm7, %v1360_v57, %v1359_v8 }
 0x45f   : > { %v1720_v11 = vrot.slane %v1462_v3, 2 }
 0x460   : > { %v3252_v36 = vpop.eup %2219 }
 0x461   : > { %v973_v28 = vsel %vm606_vm9, %v3252_v36, 0.0 }
 0x462   : > { %974 = vadd.xlane.f32.xlu1 %v973_v28  ;;  %v1718_v28 = vrot.slane %v1461_v30, 3 }
 0x464   : > { %v3256_v15 = vpop.eup %2221 }
 0x465   : > { %v1335_v27 = vsel %vm606_vm9, %v3256_v15, 0.0 }
 0x466   : > { %1336 = vadd.xlane.f32.xlu0 %v1335_v27  ;;  %v1717_v27 = vsel %vm389_vm4, %v1716_v61, %v1715_v23 }
 0x467   : > { %v1719_v37 = vsel %vm392_vm5, %v1718_v28, %v1717_v27 }
 0x468   : > { %v3260_v41 = vpop.eup %2223  ;;  %v1721_v7 = vsel %vm395_vm6, %v1720_v11, %v1719_v37 }
 0x469   : > { %v1697_v63 = vsel %vm606_vm9, %v3260_v41, 0.0  ;;  %v1723_v42 = vsel %vm398_vm7, %v1722_v54, %v1721_v7 }
 0x46a   : > { %1698 = vadd.xlane.f32.xlu1 %v1697_v63 }
 0x4ef   : > { %v975_v40 = vpop.xlane.xlu1 %974 }
 0x4f0   : > { %2225 = vrcp.f32 %v975_v40 }
 0x4f3   : > { %v1337_v33 = vpop.xlane.xlu0 %1336 }
 0x4f4   : > { %2227 = vrcp.f32 %v1337_v33 }
 0x4f7   : > { %v1699_v63 = vpop.xlane.xlu1 %1698 }
 0x4f8   : > { %2229 = vrcp.f32 %v1699_v63 }
 0x4fa   : > { %v2226_v52 = vpop.eup %2225 }
 0x4fb   : > { %v977_v26 = vmul.f32 %v2226_v52, %v3252_v36 }
 0x4fd   : > { %2044 = vst.msk [vmem:[%s3223_s27 + $0x8] sm:$0xff] %vm606_vm9, %v977_v26  ;;  %2102 = vmatmul.mubr.msk.f32.vlgmr.msra.gmra.mrb[2].mxu0 %vm606_vm9, %v977_v26 }
 0x4fe   : > { %v2228_v58 = vpop.eup %2227  ;;  %2110 = vmatpush3.msra.mxu0 %v1361_v16  ;;  %2111 = vmatprep.mubr.msk.f32.mxu0 %vm2447_vm0, %v3493_v43 }
 0x4ff   : > { %v1339_v36 = vmul.f32 %v2228_v58, %v3256_v15  ;;  %2119 = vmatprep.subr.mxu0 %v3493_v43 }
 0x501   : > { %2049 = vst.msk [vmem:[%s3223_s27 + $0x10] sm:$0xff] %vm606_vm9, %v1339_v36  ;;  %2112 = vmatmul.mubr.msk.f32.vlgmr.msra.gmra.mrb[4].mxu0 %vm606_vm9, %v1339_v36 }
 0x502   : > { %v2230_v5 = vpop.eup %2229  ;;  %2120 = vmatpush3.msra.mxu0 %v1723_v42  ;;  %2121 = vmatprep.mubr.msk.f32.mxu0 %vm2447_vm0, %v3493_v43 }
 0x503   : > { %v1701_v49 = vmul.f32 %v2230_v5, %v3260_v41 }
 0x505   : > { %2054 = vst.msk [vmem:[%s3223_s27 + $0x18] sm:$0xff] %vm606_vm9, %v1701_v49  ;;  %2122 = vmatmul.mubr.msk.f32.vlgmr.msra.gmra.mrb[6].mxu0 %vm606_vm9, %v1701_v49 }
 0x506   : > { %2334 = shalt.err (!%p2331_p13)
}
 0x507   : > { %s2335_s10 = scalar_lea.hbm %s3334_s11, 512  ;;  %s2339_s26 = scalar_lea.hbm %s3435_s4, 1024 }
 0x508   : > { %p2336_p11 = scmp.ne.s32.totalorder %s3334_s11, %s2335_s10  ;;  %p2340_p7 = scmp.lt.u32.totalorder %s3334_s11, %s3435_s4 }
 0x509   : > { %p2341_p4 = scmp.lt.u32.totalorder %s2339_s26, %s2335_s10  ;;  %p2343_p0 = scmp.lt.u32.totalorder %s2335_s10, %s3334_s11 }
 0x50a   : > { %p2337_p2 = pnand %p2336_p11, %p3516_p10 }
 0x50b   : > { %p2342_p3 = por %p2341_p4, %p2340_p7 }
 0x50c   : > { %p2338_p5 = pneg %p2337_p2 }
 0x50d   : > { %p2344_p8 = por %p2343_p0, %p2342_p3 }
 0x50f   : > { %p2345_p9 = pnand %p2344_p8, %p2338_p5 }
 0x511   : > { %2348 = shalt.err (!%p2345_p9)
}
 0x512   : > { %s2449_s13 = smov 128   ;;  %s2450_s21 = smov 8  }
 0x513   : > { %2131 = dma.vmem_to_hbm [thread:$0]  (%p3516_p10), %s3336_s9, 512, %s3334_s11, %s1808_s12, %s2449_s13, %s2449_s13, %s2450_s21  }
 0x514   : > { %s1824_s27 = sshll.u32 %s3245_s19, 4  ;;  %s3377_s9 = scalar_lea.hbm %s3434_s3, %s2066_s29  ;;  %s3370_s27 = int_to_ptr.vmem [resolvable:$true] %s1824_s27 }
 0x515   : > { %s1803_s11 = scalar_lea.sflag [#allocation4], %s2687_s25  ;;  %s2349_s12 = scalar_lea.vmem %s3370_s27, 512 }
 0x516   : > { %p2350_p12 = scmp.ne.s32.totalorder %s3370_s27, %s2349_s12  ;;  %s2451_s20 = smov [#allocation8]  }
 0x517   : > { %s2353_s18 = sshll.u32 %s2451_s20, 4  ;;  %s2354_s18 = int_to_ptr.vmem [resolvable:$false] %s2353_s18 }
 0x518   : > { %p2351_p1 = pnand %p2350_p12, %p3516_p10  ;;  %s2355_s1 = scalar_lea.vmem %s2354_s18, 1024 }
 0x519   : > { %p2356_p13 = scmp.lt.s32.totalorder %s3370_s27, %s2354_s18  ;;  %p2357_p11 = scmp.lt.s32.totalorder %s2355_s1, %s2349_s12 }
 0x51a   : > { %p2352_p6 = pneg %p2351_p1 }
 0x51b   : > { %p2358_p2 = por %p2357_p11, %p2356_p13 }
 0x51d   : > { %p2359_p5 = pnand %p2358_p2, %p2352_p6 }
 0x5d0   : > { %v1070_v43 = vpop.f32.mrb[2].mxu0 }
 0x5d1   : > { %2043 = vst.msk [vmem:[%s3245_s19 + $0x8] sm:$0xff] %vm422_vm8, %v1070_v43  ;;  %v2103_v15 = vpop.f32.mrb[3].mxu0 }
 0x5d4   : > { %v1432_v41 = vpop.f32.mrb[4].mxu0 }
 0x5d5   : > { %2048 = vst.msk [vmem:[%s3245_s19 + $0x10] sm:$0xff] %vm422_vm8, %v1432_v41  ;;  %v2113_v29 = vpop.f32.mrb[5].mxu0 }
 0x5d8   : > { %v1794_v51 = vpop.f32.mrb[6].mxu0 }
 0x5d9   : > { %2053 = vst.msk [vmem:[%s3245_s19 + $0x18] sm:$0xff] %vm422_vm8, %v1794_v51  ;;  %v2123_v34 = vpop.f32.mrb[7].mxu0 }
 0x5da   : > { %2362 = shalt.err (!%p2359_p5)
}
 0x5db   : > { %s2363_s19 = scalar_lea.hbm %s3377_s9, 512  ;;  %s2367_s6 = scalar_lea.hbm %s3434_s3, 1024 }
 0x5dc   : > { %p2364_p7 = scmp.ne.s32.totalorder %s3377_s9, %s2363_s19  ;;  %p2368_p0 = scmp.lt.u32.totalorder %s3377_s9, %s3434_s3 }
 0x5dd   : > { %p2369_p8 = scmp.lt.u32.totalorder %s2367_s6, %s2363_s19  ;;  %p2371_p12 = scmp.lt.u32.totalorder %s2363_s19, %s3377_s9 }
 0x5de   : > { %p2365_p4 = pnand %p2364_p7, %p3516_p10 }
 0x5df   : > { %p2370_p9 = por %p2369_p8, %p2368_p0 }
 0x5e0   : > { %p2366_p3 = pneg %p2365_p4 }
 0x5e1   : > { %p2372_p1 = por %p2371_p12, %p2370_p9 }
 0x5e3   : > { %p2373_p6 = pnand %p2372_p1, %p2366_p3 }
 0x5e5   : > { %2376 = shalt.err (!%p2373_p6)
}
 0x5e6   : > { %2130 = dma.vmem_to_hbm [thread:$0]  (%p3516_p10), %s3370_s27, 512, %s3377_s9, %s1803_s11, %s2449_s13, %s2449_s13, %s2450_s21  }
 0x5e7 PF: > { %s3517_s8 = sld [smem:[#allocation16_spill]]  ;;  %s1858_s26 = sand.u32 1, %s2419_s15  }
 0x5e8   : > { %p3518_p13 = scmp.ne.s32.totalorder %s3469_s30, 0  ;;  %s1859_s22 = scalar_lea.sflag [#allocation4], %s1858_s26 }
 0x5ed   : > { %p3519_p11 = scmp.ge.s32.totalorder %s3517_s8, 2 }
 0x5ef   : > { %p2145_p2 = pnand %p3519_p11, %p3518_p13 }
 0x5f1   : > { %2410 = dma.done.wait (!%p2145_p2), %s1859_s22, 512  }
 0x5f2   : > { %2412 = vsyncadd (!%p2145_p2), %s1859_s22, 4294966784  ;;  %s1868_s28 = scalar_lea.sflag [#allocation10], %s1858_s26 }
 0x5f3   : > { %2414 = dma.done.wait (!%p2145_p2), %s1868_s28, 512  }
 0x5f4   : > { %2416 = vsyncadd (!%p2145_p2), %s1868_s28, 4294966784  ;;  %s27_s20 = sadd.s32 1, %s3517_s8   ;;  %s3520_s25 = sld [smem:[#allocation18_spill]] }
 0x5f5   : > { %p24_p5 = scmp.ge.s32.totalorder %s27_s20, 4   ;;  %s3521_s18 = sld [smem:[#allocation15_spill]] }
 0x5f6   : > { %s3522_s19 = sld [smem:[#allocation17_spill]]  ;;  %s3523_s15 = smov %s2423_s16 }
 0x5f7   : > { %s3524_s16 = smov %s2427_s17  ;;  %26 = sbr.rel (!%p24_p5) target bundleno = 12 (0xc), region = 124 }
 0x5fa   : > { %s3525_s17 = smov %s3520_s25 }
 0x5fe   :  { %1873 = vsyncpa [#allocation3], 1 }
 0x5ff   :  { %1875 = vsyncpa [#allocation3 + $0x1], 1 }
 0x600   :  { %1876 = vsyncpa [#allocation6], 1 }
 0x601   :  { %1878 = vsyncpa [#allocation6 + $0x1], 1 }
 0x602   :  { %1879 = vsyncpa [#allocation4], 1 }
 0x603   :  { %1881 = vsyncpa [#allocation4 + $0x1], 1 }
 0x604   :  { %1882 = vsyncpa [#allocation10], 1 }
 0x605   :  { %1884 = vsyncpa [#allocation10 + $0x1], 1 }

</bundles_post_ra>
